<compile_context>
chip_gen: v6e
topology: v6e:2x2x1
jax: 0.10.0
libtpu: 0.0.40
codegen_flags: <defaults>
</compile_context>

<pallas_src>
import functools

import jax
import jax.numpy as jnp
from jax.experimental import pallas as pl
from jax.experimental.pallas import tpu as pltpu


def _round_up(x, m):
    return (x + m - 1) // m * m


def _vmem_limit_bytes():
    """~75% of physical VMEM, capped at 100 MiB (v5e/v6e -> 96 MiB, v7x -> 48 MiB)."""
    try:
        cap = int(pltpu.get_tpu_info().vmem_capacity_bytes)
    except Exception:
        cap = 64 * 1024 * 1024
    return min(cap * 3 // 4, 100 * 1024 * 1024)


_VMEM_LIMIT = _vmem_limit_bytes()
_TIME_CHUNK = 16     # bf16 sublane tile -> chunk stores / reshapes stay aligned


def _vocab_tile(vp):
    """Largest lane-dense vocab tile the per-chip VMEM budget supports."""
    max_vt = 512 if _VMEM_LIMIT >= (64 << 20) else 256
    for t in (512, 256, 128):
        if t <= max_vt and vp % t == 0:
            return t
    return 128


def gru_decoder_kernel(seqlen_ref, emb_ref, z_ref,
                       w_e_ref, w_zg_ref, b_ih_ref,
                       w_hh_ref, b_hh_ref,
                       w_z2h_ref, b_z2h_ref,
                       w_out_ref, b_out_ref,
                       y_ref,
                       hs_ref, ge_ref, hsc_ref):
    """Grid: (batch tiles, vocab tiles).  The vocab axis is 'arbitrary' because
    the batch-major hidden-state scratch written at v == 0 is reused by every
    vocab tile of that batch tile.

    seqlen_ref : [Bt, 1]    int32
    emb_ref    : [Tp, Bt, E]  bf16  (time-major, T padded to a 16 multiple)
    z_ref      : [Bt, L]    f32
    w_e_ref    : [E, 3Hp]   bf16   (emb part of weight_ih_l0, gates r|z|n)
    w_zg_ref   : [L, 3Hp]   f32    (z   part of weight_ih_l0)
    b_ih_ref   : [1, 3Hp]   f32
    w_hh_ref   : [Hp, 3Hp]  bf16,  b_hh_ref : [1, 3Hp] f32
    w_z2h_ref  : [L, Hp]    f32,   b_z2h_ref: [1, Hp]  f32
    w_out_ref  : [Hp, Vt]   bf16,  b_out_ref: [1, Vt]  f32
    y_ref      : [Bt, T, Vt]  (batch-first output tile, bf16 by default)
    hs_ref     : VMEM scratch [Bt, Tp, Hp]  bf16 (batch-major hidden states,
                 persists over the vocab axis)
    ge_ref     : VMEM scratch [Tc, Bt, 3Hp] f32  (emb @ W_e for one time chunk)
    hsc_ref    : VMEM scratch [Tc, Bt, Hp]  f32  (time-major staging for one chunk)
    """
    v = pl.program_id(1)
    Tp, Bt, E = emb_ref.shape
    Hp = w_hh_ref.shape[0]
    Tc = ge_ref.shape[0]
    T = y_ref.shape[1]
    num_chunks = Tp // Tc

    @pl.when(v == 0)
    def _recurrence():
        z = z_ref[...]                                            # [Bt, L] f32

        # h0 = z2h(z)
        h0 = jnp.dot(z, w_z2h_ref[...],
                     preferred_element_type=jnp.float32) + b_z2h_ref[...]

        # z contribution of the input projection, computed once (shared over T).
        gz = jnp.dot(z, w_zg_ref[...],
                     preferred_element_type=jnp.float32) + b_ih_ref[...]  # [Bt, 3Hp]

        seq_len = seqlen_ref[...]                                 # [Bt, 1] (hoisted)
        w_e = w_e_ref[...]                                        # bf16
        w_hh = w_hh_ref[...]                                      # bf16
        b_hh = b_hh_ref[...]                                      # f32

        def run_chunk(t0, h):
            # emb contribution for this time chunk: one bf16 MXU matmul.
            # (chunk-sized f32 round-trip keeps the [Tc,Bt,E]->[Tc*Bt,E]
            #  reshape on a plain (8,128) f32 layout; MXU still gets bf16.)
            emb_c = emb_ref[t0:t0 + Tc].astype(jnp.float32).reshape(Tc * Bt, E)
            ge_ref[...] = jnp.dot(emb_c.astype(jnp.bfloat16), w_e,
                                  preferred_element_type=jnp.float32
                                  ).reshape(Tc, Bt, 3 * Hp)

            steps = min(Tc, T - t0)          # static: skip padded timesteps

            def step(ti, h):
                t = t0 + ti
                gx = ge_ref[ti] + gz                              # [Bt, 3Hp] f32
                # recurrent matmul in bf16 (f32 accumulation, f32 gate math)
                gh = jnp.dot(h.astype(jnp.bfloat16), w_hh,
                             preferred_element_type=jnp.float32) + b_hh
                # gate slices fall on 128-lane boundaries (Hp is a 128 multiple)
                r = jax.nn.sigmoid(gx[:, 0:Hp] + gh[:, 0:Hp])
                u = jax.nn.sigmoid(gx[:, Hp:2 * Hp] + gh[:, Hp:2 * Hp])
                n = jnp.tanh(gx[:, 2 * Hp:] + r * gh[:, 2 * Hp:])
                h_new = (1.0 - u) * n + u * h
                valid = t < seq_len                               # [Bt, 1] bool
                # pad_packed_sequence: outputs past seq_len are zero.
                hsc_ref[ti] = jnp.where(valid, h_new, 0.0)
                # packed GRU: hidden state does not advance past seq_len.
                return jnp.where(valid, h_new, h)

            h = jax.lax.fori_loop(0, steps, step, h, unroll=min(steps, 8))

            # time-major -> batch-major ONCE per chunk per batch tile (not per
            # vocab tile); downcast to bf16 for the output-head matmul.
            # (rows of hsc beyond `steps` are stale but never reach y_ref.)
            hs_ref[:, t0:t0 + Tc, :] = pltpu.einshape(
                "tbh->bth", hsc_ref[...]).astype(jnp.bfloat16)
            return h

        h = h0
        for c in range(num_chunks):          # static unroll -> static hs slices
            h = run_chunk(c * Tc, h)

    # Output head for this vocab tile (every grid step): bf16 MXU, lane-dense
    # bf16 store, no transpose (hs is already batch-major and bf16).
    Vt = w_out_ref.shape[1]
    hs2 = hs_ref[...].reshape(Bt * Tp, Hp)                        # bf16, contiguous
    yt = jnp.dot(hs2, w_out_ref[...],
                 preferred_element_type=jnp.float32) + b_out_ref[...]   # [Bt*Tp, Vt]
    y_ref[...] = yt.reshape(Bt, Tp, Vt)[:, :T, :].astype(y_ref.dtype)


@functools.partial(jax.jit, static_argnames=("out_dtype",))
def gru_decoder_forward(seq, seq_len, z, params, out_dtype=jnp.bfloat16):
    """JAX wrapper mirroring GRUDecoder.forward (eval mode).

    Logits are emitted in bf16 by default (output head is HBM-write-bound);
    pass out_dtype=jnp.float32 for an f32 copy of the same bf16-MXU math.
    """
    emb_table = params["embedding"]                  # [vocab, E]
    w_ih, b_ih = params["w_ih"], params["b_ih"]      # [3H, E+L], [3H]
    w_hh, b_hh = params["w_hh"], params["b_hh"]      # [3H, H],   [3H]
    w_z2h, b_z2h = params["w_z2h"], params["b_z2h"]  # [H, L],    [H]
    w_out, b_out = params["w_out"], params["b_out"]  # [V, H],    [V]

    B, T = seq.shape
    E = emb_table.shape[1]
    L = z.shape[-1]
    H = w_hh.shape[1]
    V = w_out.shape[0]

    # --- exact padding: batch -> 8 (sublanes), hidden -> 128 (lane-aligned
    #     gate slices), vocab -> 128 (lane-dense output stores), time -> 16
    #     (bf16 sublane tile for the batch-major hidden-state scratch).
    #     Padded hidden units stay identically 0 through the recurrence;
    #     padded batch rows / vocab columns / timesteps are sliced off.
    Bp = _round_up(B, 8)
    if Bp > 128:
        Bp = _round_up(Bp, 128)    # never a giant whole-batch tile
        Bt = 128
    else:
        Bt = Bp
    # TODO(synk): on v7x (2 TensorCores) split Bt in half when Bp <= 128 so
    # both cores get a batch tile.
    Hp = _round_up(H, 128)
    Vp = _round_up(V, 128)
    Tc = _TIME_CHUNK
    Tp = _round_up(T, Tc)

    seq_p = jnp.pad(seq, ((0, Bp - B), (0, 0)))
    seq_len_p = jnp.pad(seq_len, (0, Bp - B)).reshape(Bp, 1).astype(jnp.int32)
    z_p = jnp.pad(z, ((0, Bp - B), (0, 0))).astype(jnp.float32)

    def pad_gate_rows(w):                  # [3H, X] -> [3Hp, X] (per-gate pad)
        x = w.reshape(3, H, -1)
        return jnp.pad(x, ((0, 0), (0, Hp - H), (0, 0))).reshape(3 * Hp, -1)

    def pad_gate_vec(b):                   # [3H] -> [3Hp]
        return jnp.pad(b.reshape(3, H), ((0, 0), (0, Hp - H))).reshape(3 * Hp)

    # weight_ih_l0 columns are ordered [emb | z] (x_input = cat([emb, z], -1)).
    w_e = pad_gate_rows(w_ih[:, :E]).T.astype(jnp.bfloat16)              # [E, 3Hp]
    w_zg = pad_gate_rows(w_ih[:, E:]).T.astype(jnp.float32)              # [L, 3Hp]
    b_ih_p = pad_gate_vec(b_ih)[None, :].astype(jnp.float32)             # [1, 3Hp]

    w_hh_p = jnp.pad(pad_gate_rows(w_hh),
                     ((0, 0), (0, Hp - H))).T.astype(jnp.bfloat16)       # [Hp, 3Hp]
    b_hh_p = pad_gate_vec(b_hh)[None, :].astype(jnp.float32)             # [1, 3Hp]

    w_z2h_p = jnp.pad(w_z2h, ((0, Hp - H), (0, 0))).T.astype(jnp.float32)  # [L, Hp]
    b_z2h_p = jnp.pad(b_z2h, (0, Hp - H))[None, :].astype(jnp.float32)     # [1, Hp]

    w_out_p = jnp.pad(w_out, ((0, Vp - V), (0, Hp - H))).T.astype(jnp.bfloat16)  # [Hp, Vp]
    b_out_p = jnp.pad(b_out, (0, Vp - V))[None, :].astype(jnp.float32)           # [1, Vp]

    # Embedding gather, produced directly time-major (transpose the tiny int32
    # index matrix, not the activations); pad the time dim to Tp.
    # emb_dropout: identity (eval).
    # TODO(synk): training-mode embedding dropout not implemented.
    emb_tm = jnp.take(emb_table, seq_p.T, axis=0).astype(jnp.bfloat16)   # [T, Bp, E]
    emb_tm = jnp.pad(emb_tm, ((0, Tp - T), (0, 0), (0, 0)))              # [Tp, Bp, E]

    Vt = _vocab_tile(Vp)
    grid = (Bp // Bt, Vp // Vt)

    y_pad = pl.pallas_call(
        gru_decoder_kernel,
        out_shape=jax.ShapeDtypeStruct((Bp, T, Vp), out_dtype),
        grid_spec=pltpu.PrefetchScalarGridSpec(
            num_scalar_prefetch=0,
            grid=grid,
            in_specs=[
                pl.BlockSpec((Bt, 1), lambda b, v: (b, 0)),          # seq_len
                pl.BlockSpec((Tp, Bt, E), lambda b, v: (0, b, 0)),   # emb (time-major)
                pl.BlockSpec((Bt, L), lambda b, v: (b, 0)),          # z
                pl.BlockSpec((E, 3 * Hp), lambda b, v: (0, 0)),      # W_e
                pl.BlockSpec((L, 3 * Hp), lambda b, v: (0, 0)),      # W_z (input proj)
                pl.BlockSpec((1, 3 * Hp), lambda b, v: (0, 0)),      # b_ih
                pl.BlockSpec((Hp, 3 * Hp), lambda b, v: (0, 0)),     # W_hh (bf16)
                pl.BlockSpec((1, 3 * Hp), lambda b, v: (0, 0)),      # b_hh
                pl.BlockSpec((L, Hp), lambda b, v: (0, 0)),          # W_z2h
                pl.BlockSpec((1, Hp), lambda b, v: (0, 0)),          # b_z2h
                pl.BlockSpec((Hp, Vt), lambda b, v: (0, v)),         # W_out tile
                pl.BlockSpec((1, Vt), lambda b, v: (0, v)),          # b_out tile
            ],
            out_specs=pl.BlockSpec((Bt, T, Vt), lambda b, v: (b, 0, v)),
            scratch_shapes=[
                pltpu.VMEM((Bt, Tp, Hp), jnp.bfloat16),       # hidden states (batch-major)
                pltpu.VMEM((Tc, Bt, 3 * Hp), jnp.float32),    # emb @ W_e (one chunk)
                pltpu.VMEM((Tc, Bt, Hp), jnp.float32),        # chunk staging (time-major)
            ],
        ),
        compiler_params=pltpu.CompilerParams(
            dimension_semantics=("parallel", "arbitrary"),
            vmem_limit_bytes=_VMEM_LIMIT,
        ),
    )(seq_len_p, emb_tm, z_p,
      w_e, w_zg, b_ih_p, w_hh_p, b_hh_p, w_z2h_p, b_z2h_p, w_out_p, b_out_p)

    # NOTE: pad_packed_sequence truncates to max(seq_len); the example is
    # constructed with max(seq_len) == T so no truncation is needed here.
    # TODO(synk): if a caller uses max(seq_len) < T, slice the time dim too.
    return y_pad[:B, :, :V]


def init_params(key, vocab_dim, emb_dim, latent_dim, hidden_dim):
    """Deterministic synthetic parameters matching the nn.Module shapes."""
    din = emb_dim + latent_dim
    ks = jax.random.split(key, 9)
    s = 0.1
    return {
        "embedding": jax.random.normal(ks[0], (vocab_dim, emb_dim), jnp.float32) * s,
        # nn.GRU(latent+emb, hidden): weight_ih_l0 [3H, Din], weight_hh_l0 [3H, H]
        "w_ih": jax.random.normal(ks[1], (3 * hidden_dim, din), jnp.float32) * s,
        "b_ih": jax.random.normal(ks[2], (3 * hidden_dim,), jnp.float32) * s,
        "w_hh": jax.random.normal(ks[3], (3 * hidden_dim, hidden_dim), jnp.float32) * s,
        "b_hh": jax.random.normal(ks[4], (3 * hidden_dim,), jnp.float32) * s,
        # z2h: Linear(latent, hidden) -> weight [H, L]
        "w_z2h": jax.random.normal(ks[5], (hidden_dim, latent_dim), jnp.float32) * s,
        "b_z2h": jax.random.normal(ks[6], (hidden_dim,), jnp.float32) * s,
        # output_head: Linear(hidden, vocab) -> weight [V, H]
        "w_out": jax.random.normal(ks[7], (vocab_dim, hidden_dim), jnp.float32) * s,
        "b_out": jax.random.normal(ks[8], (vocab_dim,), jnp.float32) * s,
    }


if __name__ == "__main__":
    # Small shapes consistent with the module (defaults scaled down).
    B, T = 2, 8
    latent_dim, hidden_dim, emb_dim, vocab_dim = 32, 32, 16, 16

    key = jax.random.PRNGKey(0)
    k_par, k_seq, k_z = jax.random.split(key, 3)

    params = init_params(k_par, vocab_dim, emb_dim, latent_dim, hidden_dim)
    seq = jax.random.randint(k_seq, (B, T), 0, vocab_dim, dtype=jnp.int32)
    seq_len = jnp.array([T, 5], dtype=jnp.int32)     # max(seq_len) == T
    z = jax.random.normal(k_z, (B, latent_dim), jnp.float32)

    y = gru_decoder_forward(seq, seq_len, z, params)
    y = jax.block_until_ready(y)
    assert y.shape == (B, T, vocab_dim)
    print("KERNEL_OK")
</pallas_src>

<mosaic_0001>
module attributes {stable_mosaic.version = 11 : i64} {
  func.func @gru_decoder_kernel(%arg0: i32, %arg1: i32, %arg2: memref<8x1xi32, #tpu.memory_space<vmem>>, %arg3: memref<16x8x16xbf16, #tpu.memory_space<vmem>>, %arg4: memref<8x32xf32, #tpu.memory_space<vmem>>, %arg5: memref<16x384xbf16, #tpu.memory_space<vmem>>, %arg6: memref<32x384xf32, #tpu.memory_space<vmem>>, %arg7: memref<1x384xf32, #tpu.memory_space<vmem>>, %arg8: memref<128x384xbf16, #tpu.memory_space<vmem>>, %arg9: memref<1x384xf32, #tpu.memory_space<vmem>>, %arg10: memref<32x128xf32, #tpu.memory_space<vmem>>, %arg11: memref<1x128xf32, #tpu.memory_space<vmem>>, %arg12: memref<128x128xbf16, #tpu.memory_space<vmem>>, %arg13: memref<1x128xf32, #tpu.memory_space<vmem>>, %arg14: memref<8x8x128xbf16, #tpu.memory_space<vmem>>, %arg15: memref<8x16x128xbf16, #tpu.memory_space<vmem>>, %arg16: memref<16x8x384xf32, #tpu.memory_space<vmem>>, %arg17: memref<16x8x128xf32, #tpu.memory_space<vmem>>) attributes {dimension_semantics = [#tpu.dimension_semantics<parallel>, #tpu.dimension_semantics<arbitrary>], iteration_bounds = array<i64: 1, 1>, scalar_prefetch = 0 : i64, scratch_operands = 3 : i64, tpu.core_type = #tpu.core_type<tc>, window_params = [{transform_indices = @transform_0, window_bounds = array<i64: 8, 1>}, {transform_indices = @transform_1, window_bounds = array<i64: 16, 8, 16>}, {transform_indices = @transform_2, window_bounds = array<i64: 8, 32>}, {pipeline_mode = #tpu.pipeline_mode<synchronous>, transform_indices = @transform_3, window_bounds = array<i64: 16, 384>}, {pipeline_mode = #tpu.pipeline_mode<synchronous>, transform_indices = @transform_4, window_bounds = array<i64: 32, 384>}, {pipeline_mode = #tpu.pipeline_mode<synchronous>, transform_indices = @transform_5, window_bounds = array<i64: 1, 384>}, {pipeline_mode = #tpu.pipeline_mode<synchronous>, transform_indices = @transform_6, window_bounds = array<i64: 128, 384>}, {pipeline_mode = #tpu.pipeline_mode<synchronous>, transform_indices = @transform_7, window_bounds = array<i64: 1, 384>}, {pipeline_mode = #tpu.pipeline_mode<synchronous>, transform_indices = @transform_8, window_bounds = array<i64: 32, 128>}, {pipeline_mode = #tpu.pipeline_mode<synchronous>, transform_indices = @transform_9, window_bounds = array<i64: 1, 128>}, {transform_indices = @transform_10, window_bounds = array<i64: 128, 128>}, {transform_indices = @transform_11, window_bounds = array<i64: 1, 128>}, {transform_indices = @transform_12, window_bounds = array<i64: 8, 8, 128>}]} {
    %c0_i32 = arith.constant 0 : i32
    %0 = arith.cmpi eq, %arg1, %c0_i32 : i32
    %1 = arith.extui %0 : i1 to i32
    %c0_i32_0 = arith.constant 0 : i32
    %2 = arith.cmpi ne, %1, %c0_i32_0 : i32
    scf.if %2 {
      %c0_10 = arith.constant 0 : index
      %c0_11 = arith.constant 0 : index
      %14 = vector.load %arg4[%c0_10, %c0_11] : memref<8x32xf32, #tpu.memory_space<vmem>>, vector<8x32xf32>
      %c0_12 = arith.constant 0 : index
      %c0_13 = arith.constant 0 : index
      %15 = vector.load %arg10[%c0_12, %c0_13] : memref<32x128xf32, #tpu.memory_space<vmem>>, vector<32x128xf32>
      %cst_14 = arith.constant dense<0.000000e+00> : vector<8x128xf32>
      %16 = tpu.matmul %14, %15, %cst_14 {dimension_numbers = #tpu.dot_dimension_numbers<[1], [0], [0], [1], [0, 0, 1, 1], [], []>} : vector<8x32xf32>, vector<32x128xf32>, vector<8x128xf32> -> vector<8x128xf32>
      %c0_15 = arith.constant 0 : index
      %c0_16 = arith.constant 0 : index
      %17 = vector.load %arg11[%c0_15, %c0_16] : memref<1x128xf32, #tpu.memory_space<vmem>>, vector<1x128xf32>
      %18 = vector.broadcast %17 : vector<1x128xf32> to vector<8x128xf32>
      %19 = arith.addf %16, %18 : vector<8x128xf32>
      %c0_17 = arith.constant 0 : index
      %c0_18 = arith.constant 0 : index
      %20 = vector.load %arg6[%c0_17, %c0_18] : memref<32x384xf32, #tpu.memory_space<vmem>>, vector<32x384xf32>
      %cst_19 = arith.constant dense<0.000000e+00> : vector<8x384xf32>
      %21 = tpu.matmul %14, %20, %cst_19 {dimension_numbers = #tpu.dot_dimension_numbers<[1], [0], [0], [1], [0, 0, 1, 1], [], []>} : vector<8x32xf32>, vector<32x384xf32>, vector<8x384xf32> -> vector<8x384xf32>
      %c0_20 = arith.constant 0 : index
      %c0_21 = arith.constant 0 : index
      %22 = vector.load %arg7[%c0_20, %c0_21] : memref<1x384xf32, #tpu.memory_space<vmem>>, vector<1x384xf32>
      %23 = vector.broadcast %22 : vector<1x384xf32> to vector<8x384xf32>
      %24 = arith.addf %21, %23 : vector<8x384xf32>
      %c0_22 = arith.constant 0 : index
      %c0_23 = arith.constant 0 : index
      %25 = vector.load %arg2[%c0_22, %c0_23] : memref<8x1xi32, #tpu.memory_space<vmem>>, vector<8x1xi32>
      %c0_24 = arith.constant 0 : index
      %c0_25 = arith.constant 0 : index
      %26 = vector.load %arg5[%c0_24, %c0_25] : memref<16x384xbf16, #tpu.memory_space<vmem>>, vector<16x384xbf16>
      %c0_26 = arith.constant 0 : index
      %c0_27 = arith.constant 0 : index
      %27 = vector.load %arg8[%c0_26, %c0_27] : memref<128x384xbf16, #tpu.memory_space<vmem>>, vector<128x384xbf16>
      %c0_28 = arith.constant 0 : index
      %c0_29 = arith.constant 0 : index
      %28 = vector.load %arg9[%c0_28, %c0_29] : memref<1x384xf32, #tpu.memory_space<vmem>>, vector<1x384xf32>
      %c0_30 = arith.constant 0 : index
      %c0_31 = arith.constant 0 : index
      %c0_32 = arith.constant 0 : index
      %29 = vector.load %arg3[%c0_30, %c0_31, %c0_32] : memref<16x8x16xbf16, #tpu.memory_space<vmem>>, vector<16x8x16xbf16>
      %30 = arith.extf %29 : vector<16x8x16xbf16> to vector<16x8x16xf32>
      %31 = vector.shape_cast %30 : vector<16x8x16xf32> to vector<128x16xf32>
      %32 = arith.truncf %31 : vector<128x16xf32> to vector<128x16xbf16>
      %cst_33 = arith.constant dense<0.000000e+00> : vector<128x384xf32>
      %33 = tpu.matmul %32, %26, %cst_33 {dimension_numbers = #tpu.dot_dimension_numbers<[1], [0], [0], [1], [0, 0, 1, 1], [], []>} : vector<128x16xbf16>, vector<16x384xbf16>, vector<128x384xf32> -> vector<128x384xf32>
      %34 = vector.shape_cast %33 : vector<128x384xf32> to vector<16x8x384xf32>
      %c0_34 = arith.constant 0 : index
      %c0_35 = arith.constant 0 : index
      %c0_36 = arith.constant 0 : index
      %35 = vector.load %arg16[%c0_34, %c0_35, %c0_36] : memref<16x8x384xf32, #tpu.memory_space<vmem>>, vector<16x8x384xf32>
      tpu.vector_store %arg16[%c0_34, %c0_35, %c0_36], %34 {strides = array<i32>} : memref<16x8x384xf32, #tpu.memory_space<vmem>>, vector<16x8x384xf32>,
      %c0_i32_37 = arith.constant 0 : i32
      %c0_i32_38 = arith.constant 0 : i32
      %36 = arith.addi %c0_i32_38, %c0_i32_37 : i32
      %37 = arith.index_cast %c0_i32_37 : i32 to index
      %c0_39 = arith.constant 0 : index
      %c0_40 = arith.constant 0 : index
      %38 = vector.load %arg16[%37, %c0_39, %c0_40] : memref<16x8x384xf32, #tpu.memory_space<vmem>>, vector<1x8x384xf32>
      %39 = vector.shape_cast %38 : vector<1x8x384xf32> to vector<8x384xf32>
      %40 = arith.addf %39, %24 : vector<8x384xf32>
      %41 = arith.truncf %19 : vector<8x128xf32> to vector<8x128xbf16>
      %cst_41 = arith.constant dense<0.000000e+00> : vector<8x384xf32>
      %42 = tpu.matmul %41, %27, %cst_41 {dimension_numbers = #tpu.dot_dimension_numbers<[1], [0], [0], [1], [0, 0, 1, 1], [], []>} : vector<8x128xbf16>, vector<128x384xbf16>, vector<8x384xf32> -> vector<8x384xf32>
      %43 = vector.broadcast %28 : vector<1x384xf32> to vector<8x384xf32>
      %44 = arith.addf %42, %43 : vector<8x384xf32>
      %45 = vector.extract_strided_slice %40 {offsets = [0, 0], sizes = [8, 128], strides = [1, 1]} : vector<8x384xf32> to vector<8x128xf32>
      %46 = vector.extract_strided_slice %44 {offsets = [0, 0], sizes = [8, 128], strides = [1, 1]} : vector<8x384xf32> to vector<8x128xf32>
      %47 = arith.addf %45, %46 : vector<8x128xf32>
      %48 = arith.negf %47 : vector<8x128xf32>
      %49 = math.exp %48 : vector<8x128xf32>
      %cst_42 = arith.constant 1.000000e+00 : f32
      %50 = vector.broadcast %cst_42 : f32 to vector<8x128xf32>
      %51 = arith.addf %50, %49 : vector<8x128xf32>
      %52 = arith.divf %50, %51 : vector<8x128xf32>
      %53 = vector.extract_strided_slice %40 {offsets = [0, 128], sizes = [8, 128], strides = [1, 1]} : vector<8x384xf32> to vector<8x128xf32>
      %54 = vector.extract_strided_slice %44 {offsets = [0, 128], sizes = [8, 128], strides = [1, 1]} : vector<8x384xf32> to vector<8x128xf32>
      %55 = arith.addf %53, %54 : vector<8x128xf32>
      %56 = arith.negf %55 : vector<8x128xf32>
      %57 = math.exp %56 : vector<8x128xf32>
      %cst_43 = arith.constant 1.000000e+00 : f32
      %58 = vector.broadcast %cst_43 : f32 to vector<8x128xf32>
      %59 = arith.addf %58, %57 : vector<8x128xf32>
      %60 = arith.divf %58, %59 : vector<8x128xf32>
      %61 = vector.extract_strided_slice %40 {offsets = [0, 256], sizes = [8, 128], strides = [1, 1]} : vector<8x384xf32> to vector<8x128xf32>
      %62 = vector.extract_strided_slice %44 {offsets = [0, 256], sizes = [8, 128], strides = [1, 1]} : vector<8x384xf32> to vector<8x128xf32>
      %63 = arith.mulf %52, %62 : vector<8x128xf32>
      %64 = arith.addf %61, %63 : vector<8x128xf32>
      %65 = math.tanh %64 : vector<8x128xf32>
      %cst_44 = arith.constant 1.000000e+00 : f32
      %66 = vector.broadcast %cst_44 : f32 to vector<8x128xf32>
      %67 = arith.subf %66, %60 : vector<8x128xf32>
      %68 = arith.mulf %67, %65 : vector<8x128xf32>
      %69 = arith.mulf %60, %19 : vector<8x128xf32>
      %70 = arith.addf %68, %69 : vector<8x128xf32>
      %71 = vector.broadcast %36 : i32 to vector<8x1xi32>
      %72 = arith.cmpi slt, %71, %25 : vector<8x1xi32>
      %cst_45 = arith.constant 0.000000e+00 : f32
      %73 = vector.shape_cast %72 : vector<8x1xi1> to vector<8x1xi1>
      %74 = vector.broadcast %73 : vector<8x1xi1> to vector<8x128xi1>
      %75 = vector.broadcast %cst_45 : f32 to vector<8x128xf32>
      %76 = arith.select %74, %70, %75 : vector<8x128xi1>, vector<8x128xf32>
      %77 = arith.index_cast %c0_i32_37 : i32 to index
      %c0_46 = arith.constant 0 : index
      %c0_47 = arith.constant 0 : index
      %78 = vector.load %arg17[%77, %c0_46, %c0_47] : memref<16x8x128xf32, #tpu.memory_space<vmem>>, vector<1x8x128xf32>
      %79 = vector.shape_cast %78 : vector<1x8x128xf32> to vector<8x128xf32>
      %80 = vector.shape_cast %76 : vector<8x128xf32> to vector<1x8x128xf32>
      tpu.vector_store %arg17[%77, %c0_46, %c0_47], %80 {strides = array<i32>} : memref<16x8x128xf32, #tpu.memory_space<vmem>>, vector<1x8x128xf32>,
      %81 = vector.shape_cast %72 : vector<8x1xi1> to vector<8x1xi1>
      %82 = vector.broadcast %81 : vector<8x1xi1> to vector<8x128xi1>
      %83 = arith.select %82, %70, %19 : vector<8x128xi1>, vector<8x128xf32>
      %c1_i32 = arith.constant 1 : i32
      %c0_i32_48 = arith.constant 0 : i32
      %84 = arith.addi %c0_i32_48, %c1_i32 : i32
      %85 = arith.index_cast %c1_i32 : i32 to index
      %c0_49 = arith.constant 0 : index
      %c0_50 = arith.constant 0 : index
      %86 = vector.load %arg16[%85, %c0_49, %c0_50] : memref<16x8x384xf32, #tpu.memory_space<vmem>>, vector<1x8x384xf32>
      %87 = vector.shape_cast %86 : vector<1x8x384xf32> to vector<8x384xf32>
      %88 = arith.addf %87, %24 : vector<8x384xf32>
      %89 = arith.truncf %83 : vector<8x128xf32> to vector<8x128xbf16>
      %cst_51 = arith.constant dense<0.000000e+00> : vector<8x384xf32>
      %90 = tpu.matmul %89, %27, %cst_51 {dimension_numbers = #tpu.dot_dimension_numbers<[1], [0], [0], [1], [0, 0, 1, 1], [], []>} : vector<8x128xbf16>, vector<128x384xbf16>, vector<8x384xf32> -> vector<8x384xf32>
      %91 = vector.broadcast %28 : vector<1x384xf32> to vector<8x384xf32>
      %92 = arith.addf %90, %91 : vector<8x384xf32>
      %93 = vector.extract_strided_slice %88 {offsets = [0, 0], sizes = [8, 128], strides = [1, 1]} : vector<8x384xf32> to vector<8x128xf32>
      %94 = vector.extract_strided_slice %92 {offsets = [0, 0], sizes = [8, 128], strides = [1, 1]} : vector<8x384xf32> to vector<8x128xf32>
      %95 = arith.addf %93, %94 : vector<8x128xf32>
      %96 = arith.negf %95 : vector<8x128xf32>
      %97 = math.exp %96 : vector<8x128xf32>
      %cst_52 = arith.constant 1.000000e+00 : f32
      %98 = vector.broadcast %cst_52 : f32 to vector<8x128xf32>
      %99 = arith.addf %98, %97 : vector<8x128xf32>
      %100 = arith.divf %98, %99 : vector<8x128xf32>
      %101 = vector.extract_strided_slice %88 {offsets = [0, 128], sizes = [8, 128], strides = [1, 1]} : vector<8x384xf32> to vector<8x128xf32>
      %102 = vector.extract_strided_slice %92 {offsets = [0, 128], sizes = [8, 128], strides = [1, 1]} : vector<8x384xf32> to vector<8x128xf32>
      %103 = arith.addf %101, %102 : vector<8x128xf32>
      %104 = arith.negf %103 : vector<8x128xf32>
      %105 = math.exp %104 : vector<8x128xf32>
      %cst_53 = arith.constant 1.000000e+00 : f32
      %106 = vector.broadcast %cst_53 : f32 to vector<8x128xf32>
      %107 = arith.addf %106, %105 : vector<8x128xf32>
      %108 = arith.divf %106, %107 : vector<8x128xf32>
      %109 = vector.extract_strided_slice %88 {offsets = [0, 256], sizes = [8, 128], strides = [1, 1]} : vector<8x384xf32> to vector<8x128xf32>
      %110 = vector.extract_strided_slice %92 {offsets = [0, 256], sizes = [8, 128], strides = [1, 1]} : vector<8x384xf32> to vector<8x128xf32>
      %111 = arith.mulf %100, %110 : vector<8x128xf32>
      %112 = arith.addf %109, %111 : vector<8x128xf32>
      %113 = math.tanh %112 : vector<8x128xf32>
      %cst_54 = arith.constant 1.000000e+00 : f32
      %114 = vector.broadcast %cst_54 : f32 to vector<8x128xf32>
      %115 = arith.subf %114, %108 : vector<8x128xf32>
      %116 = arith.mulf %115, %113 : vector<8x128xf32>
      %117 = arith.mulf %108, %83 : vector<8x128xf32>
      %118 = arith.addf %116, %117 : vector<8x128xf32>
      %119 = vector.broadcast %84 : i32 to vector<8x1xi32>
      %120 = arith.cmpi slt, %119, %25 : vector<8x1xi32>
      %cst_55 = arith.constant 0.000000e+00 : f32
      %121 = vector.shape_cast %120 : vector<8x1xi1> to vector<8x1xi1>
      %122 = vector.broadcast %121 : vector<8x1xi1> to vector<8x128xi1>
      %123 = vector.broadcast %cst_55 : f32 to vector<8x128xf32>
      %124 = arith.select %122, %118, %123 : vector<8x128xi1>, vector<8x128xf32>
      %125 = arith.index_cast %c1_i32 : i32 to index
      %c0_56 = arith.constant 0 : index
      %c0_57 = arith.constant 0 : index
      %126 = vector.load %arg17[%125, %c0_56, %c0_57] : memref<16x8x128xf32, #tpu.memory_space<vmem>>, vector<1x8x128xf32>
      %127 = vector.shape_cast %126 : vector<1x8x128xf32> to vector<8x128xf32>
      %128 = vector.shape_cast %124 : vector<8x128xf32> to vector<1x8x128xf32>
      tpu.vector_store %arg17[%125, %c0_56, %c0_57], %128 {strides = array<i32>} : memref<16x8x128xf32, #tpu.memory_space<vmem>>, vector<1x8x128xf32>,
      %129 = vector.shape_cast %120 : vector<8x1xi1> to vector<8x1xi1>
      %130 = vector.broadcast %129 : vector<8x1xi1> to vector<8x128xi1>
      %131 = arith.select %130, %118, %83 : vector<8x128xi1>, vector<8x128xf32>
      %c2_i32 = arith.constant 2 : i32
      %c0_i32_58 = arith.constant 0 : i32
      %132 = arith.addi %c0_i32_58, %c2_i32 : i32
      %133 = arith.index_cast %c2_i32 : i32 to index
      %c0_59 = arith.constant 0 : index
      %c0_60 = arith.constant 0 : index
      %134 = vector.load %arg16[%133, %c0_59, %c0_60] : memref<16x8x384xf32, #tpu.memory_space<vmem>>, vector<1x8x384xf32>
      %135 = vector.shape_cast %134 : vector<1x8x384xf32> to vector<8x384xf32>
      %136 = arith.addf %135, %24 : vector<8x384xf32>
      %137 = arith.truncf %131 : vector<8x128xf32> to vector<8x128xbf16>
      %cst_61 = arith.constant dense<0.000000e+00> : vector<8x384xf32>
      %138 = tpu.matmul %137, %27, %cst_61 {dimension_numbers = #tpu.dot_dimension_numbers<[1], [0], [0], [1], [0, 0, 1, 1], [], []>} : vector<8x128xbf16>, vector<128x384xbf16>, vector<8x384xf32> -> vector<8x384xf32>
      %139 = vector.broadcast %28 : vector<1x384xf32> to vector<8x384xf32>
      %140 = arith.addf %138, %139 : vector<8x384xf32>
      %141 = vector.extract_strided_slice %136 {offsets = [0, 0], sizes = [8, 128], strides = [1, 1]} : vector<8x384xf32> to vector<8x128xf32>
      %142 = vector.extract_strided_slice %140 {offsets = [0, 0], sizes = [8, 128], strides = [1, 1]} : vector<8x384xf32> to vector<8x128xf32>
      %143 = arith.addf %141, %142 : vector<8x128xf32>
      %144 = arith.negf %143 : vector<8x128xf32>
      %145 = math.exp %144 : vector<8x128xf32>
      %cst_62 = arith.constant 1.000000e+00 : f32
      %146 = vector.broadcast %cst_62 : f32 to vector<8x128xf32>
      %147 = arith.addf %146, %145 : vector<8x128xf32>
      %148 = arith.divf %146, %147 : vector<8x128xf32>
      %149 = vector.extract_strided_slice %136 {offsets = [0, 128], sizes = [8, 128], strides = [1, 1]} : vector<8x384xf32> to vector<8x128xf32>
      %150 = vector.extract_strided_slice %140 {offsets = [0, 128], sizes = [8, 128], strides = [1, 1]} : vector<8x384xf32> to vector<8x128xf32>
      %151 = arith.addf %149, %150 : vector<8x128xf32>
      %152 = arith.negf %151 : vector<8x128xf32>
      %153 = math.exp %152 : vector<8x128xf32>
      %cst_63 = arith.constant 1.000000e+00 : f32
      %154 = vector.broadcast %cst_63 : f32 to vector<8x128xf32>
      %155 = arith.addf %154, %153 : vector<8x128xf32>
      %156 = arith.divf %154, %155 : vector<8x128xf32>
      %157 = vector.extract_strided_slice %136 {offsets = [0, 256], sizes = [8, 128], strides = [1, 1]} : vector<8x384xf32> to vector<8x128xf32>
      %158 = vector.extract_strided_slice %140 {offsets = [0, 256], sizes = [8, 128], strides = [1, 1]} : vector<8x384xf32> to vector<8x128xf32>
      %159 = arith.mulf %148, %158 : vector<8x128xf32>
      %160 = arith.addf %157, %159 : vector<8x128xf32>
      %161 = math.tanh %160 : vector<8x128xf32>
      %cst_64 = arith.constant 1.000000e+00 : f32
      %162 = vector.broadcast %cst_64 : f32 to vector<8x128xf32>
      %163 = arith.subf %162, %156 : vector<8x128xf32>
      %164 = arith.mulf %163, %161 : vector<8x128xf32>
      %165 = arith.mulf %156, %131 : vector<8x128xf32>
      %166 = arith.addf %164, %165 : vector<8x128xf32>
      %167 = vector.broadcast %132 : i32 to vector<8x1xi32>
      %168 = arith.cmpi slt, %167, %25 : vector<8x1xi32>
      %cst_65 = arith.constant 0.000000e+00 : f32
      %169 = vector.shape_cast %168 : vector<8x1xi1> to vector<8x1xi1>
      %170 = vector.broadcast %169 : vector<8x1xi1> to vector<8x128xi1>
      %171 = vector.broadcast %cst_65 : f32 to vector<8x128xf32>
      %172 = arith.select %170, %166, %171 : vector<8x128xi1>, vector<8x128xf32>
      %173 = arith.index_cast %c2_i32 : i32 to index
      %c0_66 = arith.constant 0 : index
      %c0_67 = arith.constant 0 : index
      %174 = vector.load %arg17[%173, %c0_66, %c0_67] : memref<16x8x128xf32, #tpu.memory_space<vmem>>, vector<1x8x128xf32>
      %175 = vector.shape_cast %174 : vector<1x8x128xf32> to vector<8x128xf32>
      %176 = vector.shape_cast %172 : vector<8x128xf32> to vector<1x8x128xf32>
      tpu.vector_store %arg17[%173, %c0_66, %c0_67], %176 {strides = array<i32>} : memref<16x8x128xf32, #tpu.memory_space<vmem>>, vector<1x8x128xf32>,
      %177 = vector.shape_cast %168 : vector<8x1xi1> to vector<8x1xi1>
      %178 = vector.broadcast %177 : vector<8x1xi1> to vector<8x128xi1>
      %179 = arith.select %178, %166, %131 : vector<8x128xi1>, vector<8x128xf32>
      %c3_i32 = arith.constant 3 : i32
      %c0_i32_68 = arith.constant 0 : i32
      %180 = arith.addi %c0_i32_68, %c3_i32 : i32
      %181 = arith.index_cast %c3_i32 : i32 to index
      %c0_69 = arith.constant 0 : index
      %c0_70 = arith.constant 0 : index
      %182 = vector.load %arg16[%181, %c0_69, %c0_70] : memref<16x8x384xf32, #tpu.memory_space<vmem>>, vector<1x8x384xf32>
      %183 = vector.shape_cast %182 : vector<1x8x384xf32> to vector<8x384xf32>
      %184 = arith.addf %183, %24 : vector<8x384xf32>
      %185 = arith.truncf %179 : vector<8x128xf32> to vector<8x128xbf16>
      %cst_71 = arith.constant dense<0.000000e+00> : vector<8x384xf32>
      %186 = tpu.matmul %185, %27, %cst_71 {dimension_numbers = #tpu.dot_dimension_numbers<[1], [0], [0], [1], [0, 0, 1, 1], [], []>} : vector<8x128xbf16>, vector<128x384xbf16>, vector<8x384xf32> -> vector<8x384xf32>
      %187 = vector.broadcast %28 : vector<1x384xf32> to vector<8x384xf32>
      %188 = arith.addf %186, %187 : vector<8x384xf32>
      %189 = vector.extract_strided_slice %184 {offsets = [0, 0], sizes = [8, 128], strides = [1, 1]} : vector<8x384xf32> to vector<8x128xf32>
      %190 = vector.extract_strided_slice %188 {offsets = [0, 0], sizes = [8, 128], strides = [1, 1]} : vector<8x384xf32> to vector<8x128xf32>
      %191 = arith.addf %189, %190 : vector<8x128xf32>
      %192 = arith.negf %191 : vector<8x128xf32>
      %193 = math.exp %192 : vector<8x128xf32>
      %cst_72 = arith.constant 1.000000e+00 : f32
      %194 = vector.broadcast %cst_72 : f32 to vector<8x128xf32>
      %195 = arith.addf %194, %193 : vector<8x128xf32>
      %196 = arith.divf %194, %195 : vector<8x128xf32>
      %197 = vector.extract_strided_slice %184 {offsets = [0, 128], sizes = [8, 128], strides = [1, 1]} : vector<8x384xf32> to vector<8x128xf32>
      %198 = vector.extract_strided_slice %188 {offsets = [0, 128], sizes = [8, 128], strides = [1, 1]} : vector<8x384xf32> to vector<8x128xf32>
      %199 = arith.addf %197, %198 : vector<8x128xf32>
      %200 = arith.negf %199 : vector<8x128xf32>
      %201 = math.exp %200 : vector<8x128xf32>
      %cst_73 = arith.constant 1.000000e+00 : f32
      %202 = vector.broadcast %cst_73 : f32 to vector<8x128xf32>
      %203 = arith.addf %202, %201 : vector<8x128xf32>
      %204 = arith.divf %202, %203 : vector<8x128xf32>
      %205 = vector.extract_strided_slice %184 {offsets = [0, 256], sizes = [8, 128], strides = [1, 1]} : vector<8x384xf32> to vector<8x128xf32>
      %206 = vector.extract_strided_slice %188 {offsets = [0, 256], sizes = [8, 128], strides = [1, 1]} : vector<8x384xf32> to vector<8x128xf32>
      %207 = arith.mulf %196, %206 : vector<8x128xf32>
      %208 = arith.addf %205, %207 : vector<8x128xf32>
      %209 = math.tanh %208 : vector<8x128xf32>
      %cst_74 = arith.constant 1.000000e+00 : f32
      %210 = vector.broadcast %cst_74 : f32 to vector<8x128xf32>
      %211 = arith.subf %210, %204 : vector<8x128xf32>
      %212 = arith.mulf %211, %209 : vector<8x128xf32>
      %213 = arith.mulf %204, %179 : vector<8x128xf32>
      %214 = arith.addf %212, %213 : vector<8x128xf32>
      %215 = vector.broadcast %180 : i32 to vector<8x1xi32>
      %216 = arith.cmpi slt, %215, %25 : vector<8x1xi32>
      %cst_75 = arith.constant 0.000000e+00 : f32
      %217 = vector.shape_cast %216 : vector<8x1xi1> to vector<8x1xi1>
      %218 = vector.broadcast %217 : vector<8x1xi1> to vector<8x128xi1>
      %219 = vector.broadcast %cst_75 : f32 to vector<8x128xf32>
      %220 = arith.select %218, %214, %219 : vector<8x128xi1>, vector<8x128xf32>
      %221 = arith.index_cast %c3_i32 : i32 to index
      %c0_76 = arith.constant 0 : index
      %c0_77 = arith.constant 0 : index
      %222 = vector.load %arg17[%221, %c0_76, %c0_77] : memref<16x8x128xf32, #tpu.memory_space<vmem>>, vector<1x8x128xf32>
      %223 = vector.shape_cast %222 : vector<1x8x128xf32> to vector<8x128xf32>
      %224 = vector.shape_cast %220 : vector<8x128xf32> to vector<1x8x128xf32>
      tpu.vector_store %arg17[%221, %c0_76, %c0_77], %224 {strides = array<i32>} : memref<16x8x128xf32, #tpu.memory_space<vmem>>, vector<1x8x128xf32>,
      %225 = vector.shape_cast %216 : vector<8x1xi1> to vector<8x1xi1>
      %226 = vector.broadcast %225 : vector<8x1xi1> to vector<8x128xi1>
      %227 = arith.select %226, %214, %179 : vector<8x128xi1>, vector<8x128xf32>
      %c4_i32 = arith.constant 4 : i32
      %c0_i32_78 = arith.constant 0 : i32
      %228 = arith.addi %c0_i32_78, %c4_i32 : i32
      %229 = arith.index_cast %c4_i32 : i32 to index
      %c0_79 = arith.constant 0 : index
      %c0_80 = arith.constant 0 : index
      %230 = vector.load %arg16[%229, %c0_79, %c0_80] : memref<16x8x384xf32, #tpu.memory_space<vmem>>, vector<1x8x384xf32>
      %231 = vector.shape_cast %230 : vector<1x8x384xf32> to vector<8x384xf32>
      %232 = arith.addf %231, %24 : vector<8x384xf32>
      %233 = arith.truncf %227 : vector<8x128xf32> to vector<8x128xbf16>
      %cst_81 = arith.constant dense<0.000000e+00> : vector<8x384xf32>
      %234 = tpu.matmul %233, %27, %cst_81 {dimension_numbers = #tpu.dot_dimension_numbers<[1], [0], [0], [1], [0, 0, 1, 1], [], []>} : vector<8x128xbf16>, vector<128x384xbf16>, vector<8x384xf32> -> vector<8x384xf32>
      %235 = vector.broadcast %28 : vector<1x384xf32> to vector<8x384xf32>
      %236 = arith.addf %234, %235 : vector<8x384xf32>
      %237 = vector.extract_strided_slice %232 {offsets = [0, 0], sizes = [8, 128], strides = [1, 1]} : vector<8x384xf32> to vector<8x128xf32>
      %238 = vector.extract_strided_slice %236 {offsets = [0, 0], sizes = [8, 128], strides = [1, 1]} : vector<8x384xf32> to vector<8x128xf32>
      %239 = arith.addf %237, %238 : vector<8x128xf32>
      %240 = arith.negf %239 : vector<8x128xf32>
      %241 = math.exp %240 : vector<8x128xf32>
      %cst_82 = arith.constant 1.000000e+00 : f32
      %242 = vector.broadcast %cst_82 : f32 to vector<8x128xf32>
      %243 = arith.addf %242, %241 : vector<8x128xf32>
      %244 = arith.divf %242, %243 : vector<8x128xf32>
      %245 = vector.extract_strided_slice %232 {offsets = [0, 128], sizes = [8, 128], strides = [1, 1]} : vector<8x384xf32> to vector<8x128xf32>
      %246 = vector.extract_strided_slice %236 {offsets = [0, 128], sizes = [8, 128], strides = [1, 1]} : vector<8x384xf32> to vector<8x128xf32>
      %247 = arith.addf %245, %246 : vector<8x128xf32>
      %248 = arith.negf %247 : vector<8x128xf32>
      %249 = math.exp %248 : vector<8x128xf32>
      %cst_83 = arith.constant 1.000000e+00 : f32
      %250 = vector.broadcast %cst_83 : f32 to vector<8x128xf32>
      %251 = arith.addf %250, %249 : vector<8x128xf32>
      %252 = arith.divf %250, %251 : vector<8x128xf32>
      %253 = vector.extract_strided_slice %232 {offsets = [0, 256], sizes = [8, 128], strides = [1, 1]} : vector<8x384xf32> to vector<8x128xf32>
      %254 = vector.extract_strided_slice %236 {offsets = [0, 256], sizes = [8, 128], strides = [1, 1]} : vector<8x384xf32> to vector<8x128xf32>
      %255 = arith.mulf %244, %254 : vector<8x128xf32>
      %256 = arith.addf %253, %255 : vector<8x128xf32>
      %257 = math.tanh %256 : vector<8x128xf32>
      %cst_84 = arith.constant 1.000000e+00 : f32
      %258 = vector.broadcast %cst_84 : f32 to vector<8x128xf32>
      %259 = arith.subf %258, %252 : vector<8x128xf32>
      %260 = arith.mulf %259, %257 : vector<8x128xf32>
      %261 = arith.mulf %252, %227 : vector<8x128xf32>
      %262 = arith.addf %260, %261 : vector<8x128xf32>
      %263 = vector.broadcast %228 : i32 to vector<8x1xi32>
      %264 = arith.cmpi slt, %263, %25 : vector<8x1xi32>
      %cst_85 = arith.constant 0.000000e+00 : f32
      %265 = vector.shape_cast %264 : vector<8x1xi1> to vector<8x1xi1>
      %266 = vector.broadcast %265 : vector<8x1xi1> to vector<8x128xi1>
      %267 = vector.broadcast %cst_85 : f32 to vector<8x128xf32>
      %268 = arith.select %266, %262, %267 : vector<8x128xi1>, vector<8x128xf32>
      %269 = arith.index_cast %c4_i32 : i32 to index
      %c0_86 = arith.constant 0 : index
      %c0_87 = arith.constant 0 : index
      %270 = vector.load %arg17[%269, %c0_86, %c0_87] : memref<16x8x128xf32, #tpu.memory_space<vmem>>, vector<1x8x128xf32>
      %271 = vector.shape_cast %270 : vector<1x8x128xf32> to vector<8x128xf32>
      %272 = vector.shape_cast %268 : vector<8x128xf32> to vector<1x8x128xf32>
      tpu.vector_store %arg17[%269, %c0_86, %c0_87], %272 {strides = array<i32>} : memref<16x8x128xf32, #tpu.memory_space<vmem>>, vector<1x8x128xf32>,
      %273 = vector.shape_cast %264 : vector<8x1xi1> to vector<8x1xi1>
      %274 = vector.broadcast %273 : vector<8x1xi1> to vector<8x128xi1>
      %275 = arith.select %274, %262, %227 : vector<8x128xi1>, vector<8x128xf32>
      %c5_i32 = arith.constant 5 : i32
      %c0_i32_88 = arith.constant 0 : i32
      %276 = arith.addi %c0_i32_88, %c5_i32 : i32
      %277 = arith.index_cast %c5_i32 : i32 to index
      %c0_89 = arith.constant 0 : index
      %c0_90 = arith.constant 0 : index
      %278 = vector.load %arg16[%277, %c0_89, %c0_90] : memref<16x8x384xf32, #tpu.memory_space<vmem>>, vector<1x8x384xf32>
      %279 = vector.shape_cast %278 : vector<1x8x384xf32> to vector<8x384xf32>
      %280 = arith.addf %279, %24 : vector<8x384xf32>
      %281 = arith.truncf %275 : vector<8x128xf32> to vector<8x128xbf16>
      %cst_91 = arith.constant dense<0.000000e+00> : vector<8x384xf32>
      %282 = tpu.matmul %281, %27, %cst_91 {dimension_numbers = #tpu.dot_dimension_numbers<[1], [0], [0], [1], [0, 0, 1, 1], [], []>} : vector<8x128xbf16>, vector<128x384xbf16>, vector<8x384xf32> -> vector<8x384xf32>
      %283 = vector.broadcast %28 : vector<1x384xf32> to vector<8x384xf32>
      %284 = arith.addf %282, %283 : vector<8x384xf32>
      %285 = vector.extract_strided_slice %280 {offsets = [0, 0], sizes = [8, 128], strides = [1, 1]} : vector<8x384xf32> to vector<8x128xf32>
      %286 = vector.extract_strided_slice %284 {offsets = [0, 0], sizes = [8, 128], strides = [1, 1]} : vector<8x384xf32> to vector<8x128xf32>
      %287 = arith.addf %285, %286 : vector<8x128xf32>
      %288 = arith.negf %287 : vector<8x128xf32>
      %289 = math.exp %288 : vector<8x128xf32>
      %cst_92 = arith.constant 1.000000e+00 : f32
      %290 = vector.broadcast %cst_92 : f32 to vector<8x128xf32>
      %291 = arith.addf %290, %289 : vector<8x128xf32>
      %292 = arith.divf %290, %291 : vector<8x128xf32>
      %293 = vector.extract_strided_slice %280 {offsets = [0, 128], sizes = [8, 128], strides = [1, 1]} : vector<8x384xf32> to vector<8x128xf32>
      %294 = vector.extract_strided_slice %284 {offsets = [0, 128], sizes = [8, 128], strides = [1, 1]} : vector<8x384xf32> to vector<8x128xf32>
      %295 = arith.addf %293, %294 : vector<8x128xf32>
      %296 = arith.negf %295 : vector<8x128xf32>
      %297 = math.exp %296 : vector<8x128xf32>
      %cst_93 = arith.constant 1.000000e+00 : f32
      %298 = vector.broadcast %cst_93 : f32 to vector<8x128xf32>
      %299 = arith.addf %298, %297 : vector<8x128xf32>
      %300 = arith.divf %298, %299 : vector<8x128xf32>
      %301 = vector.extract_strided_slice %280 {offsets = [0, 256], sizes = [8, 128], strides = [1, 1]} : vector<8x384xf32> to vector<8x128xf32>
      %302 = vector.extract_strided_slice %284 {offsets = [0, 256], sizes = [8, 128], strides = [1, 1]} : vector<8x384xf32> to vector<8x128xf32>
      %303 = arith.mulf %292, %302 : vector<8x128xf32>
      %304 = arith.addf %301, %303 : vector<8x128xf32>
      %305 = math.tanh %304 : vector<8x128xf32>
      %cst_94 = arith.constant 1.000000e+00 : f32
      %306 = vector.broadcast %cst_94 : f32 to vector<8x128xf32>
      %307 = arith.subf %306, %300 : vector<8x128xf32>
      %308 = arith.mulf %307, %305 : vector<8x128xf32>
      %309 = arith.mulf %300, %275 : vector<8x128xf32>
      %310 = arith.addf %308, %309 : vector<8x128xf32>
      %311 = vector.broadcast %276 : i32 to vector<8x1xi32>
      %312 = arith.cmpi slt, %311, %25 : vector<8x1xi32>
      %cst_95 = arith.constant 0.000000e+00 : f32
      %313 = vector.shape_cast %312 : vector<8x1xi1> to vector<8x1xi1>
      %314 = vector.broadcast %313 : vector<8x1xi1> to vector<8x128xi1>
      %315 = vector.broadcast %cst_95 : f32 to vector<8x128xf32>
      %316 = arith.select %314, %310, %315 : vector<8x128xi1>, vector<8x128xf32>
      %317 = arith.index_cast %c5_i32 : i32 to index
      %c0_96 = arith.constant 0 : index
      %c0_97 = arith.constant 0 : index
      %318 = vector.load %arg17[%317, %c0_96, %c0_97] : memref<16x8x128xf32, #tpu.memory_space<vmem>>, vector<1x8x128xf32>
      %319 = vector.shape_cast %318 : vector<1x8x128xf32> to vector<8x128xf32>
      %320 = vector.shape_cast %316 : vector<8x128xf32> to vector<1x8x128xf32>
      tpu.vector_store %arg17[%317, %c0_96, %c0_97], %320 {strides = array<i32>} : memref<16x8x128xf32, #tpu.memory_space<vmem>>, vector<1x8x128xf32>,
      %321 = vector.shape_cast %312 : vector<8x1xi1> to vector<8x1xi1>
      %322 = vector.broadcast %321 : vector<8x1xi1> to vector<8x128xi1>
      %323 = arith.select %322, %310, %275 : vector<8x128xi1>, vector<8x128xf32>
      %c6_i32 = arith.constant 6 : i32
      %c0_i32_98 = arith.constant 0 : i32
      %324 = arith.addi %c0_i32_98, %c6_i32 : i32
      %325 = arith.index_cast %c6_i32 : i32 to index
      %c0_99 = arith.constant 0 : index
      %c0_100 = arith.constant 0 : index
      %326 = vector.load %arg16[%325, %c0_99, %c0_100] : memref<16x8x384xf32, #tpu.memory_space<vmem>>, vector<1x8x384xf32>
      %327 = vector.shape_cast %326 : vector<1x8x384xf32> to vector<8x384xf32>
      %328 = arith.addf %327, %24 : vector<8x384xf32>
      %329 = arith.truncf %323 : vector<8x128xf32> to vector<8x128xbf16>
      %cst_101 = arith.constant dense<0.000000e+00> : vector<8x384xf32>
      %330 = tpu.matmul %329, %27, %cst_101 {dimension_numbers = #tpu.dot_dimension_numbers<[1], [0], [0], [1], [0, 0, 1, 1], [], []>} : vector<8x128xbf16>, vector<128x384xbf16>, vector<8x384xf32> -> vector<8x384xf32>
      %331 = vector.broadcast %28 : vector<1x384xf32> to vector<8x384xf32>
      %332 = arith.addf %330, %331 : vector<8x384xf32>
      %333 = vector.extract_strided_slice %328 {offsets = [0, 0], sizes = [8, 128], strides = [1, 1]} : vector<8x384xf32> to vector<8x128xf32>
      %334 = vector.extract_strided_slice %332 {offsets = [0, 0], sizes = [8, 128], strides = [1, 1]} : vector<8x384xf32> to vector<8x128xf32>
      %335 = arith.addf %333, %334 : vector<8x128xf32>
      %336 = arith.negf %335 : vector<8x128xf32>
      %337 = math.exp %336 : vector<8x128xf32>
      %cst_102 = arith.constant 1.000000e+00 : f32
      %338 = vector.broadcast %cst_102 : f32 to vector<8x128xf32>
      %339 = arith.addf %338, %337 : vector<8x128xf32>
      %340 = arith.divf %338, %339 : vector<8x128xf32>
      %341 = vector.extract_strided_slice %328 {offsets = [0, 128], sizes = [8, 128], strides = [1, 1]} : vector<8x384xf32> to vector<8x128xf32>
      %342 = vector.extract_strided_slice %332 {offsets = [0, 128], sizes = [8, 128], strides = [1, 1]} : vector<8x384xf32> to vector<8x128xf32>
      %343 = arith.addf %341, %342 : vector<8x128xf32>
      %344 = arith.negf %343 : vector<8x128xf32>
      %345 = math.exp %344 : vector<8x128xf32>
      %cst_103 = arith.constant 1.000000e+00 : f32
      %346 = vector.broadcast %cst_103 : f32 to vector<8x128xf32>
      %347 = arith.addf %346, %345 : vector<8x128xf32>
      %348 = arith.divf %346, %347 : vector<8x128xf32>
      %349 = vector.extract_strided_slice %328 {offsets = [0, 256], sizes = [8, 128], strides = [1, 1]} : vector<8x384xf32> to vector<8x128xf32>
      %350 = vector.extract_strided_slice %332 {offsets = [0, 256], sizes = [8, 128], strides = [1, 1]} : vector<8x384xf32> to vector<8x128xf32>
      %351 = arith.mulf %340, %350 : vector<8x128xf32>
      %352 = arith.addf %349, %351 : vector<8x128xf32>
      %353 = math.tanh %352 : vector<8x128xf32>
      %cst_104 = arith.constant 1.000000e+00 : f32
      %354 = vector.broadcast %cst_104 : f32 to vector<8x128xf32>
      %355 = arith.subf %354, %348 : vector<8x128xf32>
      %356 = arith.mulf %355, %353 : vector<8x128xf32>
      %357 = arith.mulf %348, %323 : vector<8x128xf32>
      %358 = arith.addf %356, %357 : vector<8x128xf32>
      %359 = vector.broadcast %324 : i32 to vector<8x1xi32>
      %360 = arith.cmpi slt, %359, %25 : vector<8x1xi32>
      %cst_105 = arith.constant 0.000000e+00 : f32
      %361 = vector.shape_cast %360 : vector<8x1xi1> to vector<8x1xi1>
      %362 = vector.broadcast %361 : vector<8x1xi1> to vector<8x128xi1>
      %363 = vector.broadcast %cst_105 : f32 to vector<8x128xf32>
      %364 = arith.select %362, %358, %363 : vector<8x128xi1>, vector<8x128xf32>
      %365 = arith.index_cast %c6_i32 : i32 to index
      %c0_106 = arith.constant 0 : index
      %c0_107 = arith.constant 0 : index
      %366 = vector.load %arg17[%365, %c0_106, %c0_107] : memref<16x8x128xf32, #tpu.memory_space<vmem>>, vector<1x8x128xf32>
      %367 = vector.shape_cast %366 : vector<1x8x128xf32> to vector<8x128xf32>
      %368 = vector.shape_cast %364 : vector<8x128xf32> to vector<1x8x128xf32>
      tpu.vector_store %arg17[%365, %c0_106, %c0_107], %368 {strides = array<i32>} : memref<16x8x128xf32, #tpu.memory_space<vmem>>, vector<1x8x128xf32>,
      %369 = vector.shape_cast %360 : vector<8x1xi1> to vector<8x1xi1>
      %370 = vector.broadcast %369 : vector<8x1xi1> to vector<8x128xi1>
      %371 = arith.select %370, %358, %323 : vector<8x128xi1>, vector<8x128xf32>
      %c7_i32 = arith.constant 7 : i32
      %c0_i32_108 = arith.constant 0 : i32
      %372 = arith.addi %c0_i32_108, %c7_i32 : i32
      %373 = arith.index_cast %c7_i32 : i32 to index
      %c0_109 = arith.constant 0 : index
      %c0_110 = arith.constant 0 : index
      %374 = vector.load %arg16[%373, %c0_109, %c0_110] : memref<16x8x384xf32, #tpu.memory_space<vmem>>, vector<1x8x384xf32>
      %375 = vector.shape_cast %374 : vector<1x8x384xf32> to vector<8x384xf32>
      %376 = arith.addf %375, %24 : vector<8x384xf32>
      %377 = arith.truncf %371 : vector<8x128xf32> to vector<8x128xbf16>
      %cst_111 = arith.constant dense<0.000000e+00> : vector<8x384xf32>
      %378 = tpu.matmul %377, %27, %cst_111 {dimension_numbers = #tpu.dot_dimension_numbers<[1], [0], [0], [1], [0, 0, 1, 1], [], []>} : vector<8x128xbf16>, vector<128x384xbf16>, vector<8x384xf32> -> vector<8x384xf32>
      %379 = vector.broadcast %28 : vector<1x384xf32> to vector<8x384xf32>
      %380 = arith.addf %378, %379 : vector<8x384xf32>
      %381 = vector.extract_strided_slice %376 {offsets = [0, 0], sizes = [8, 128], strides = [1, 1]} : vector<8x384xf32> to vector<8x128xf32>
      %382 = vector.extract_strided_slice %380 {offsets = [0, 0], sizes = [8, 128], strides = [1, 1]} : vector<8x384xf32> to vector<8x128xf32>
      %383 = arith.addf %381, %382 : vector<8x128xf32>
      %384 = arith.negf %383 : vector<8x128xf32>
      %385 = math.exp %384 : vector<8x128xf32>
      %cst_112 = arith.constant 1.000000e+00 : f32
      %386 = vector.broadcast %cst_112 : f32 to vector<8x128xf32>
      %387 = arith.addf %386, %385 : vector<8x128xf32>
      %388 = arith.divf %386, %387 : vector<8x128xf32>
      %389 = vector.extract_strided_slice %376 {offsets = [0, 128], sizes = [8, 128], strides = [1, 1]} : vector<8x384xf32> to vector<8x128xf32>
      %390 = vector.extract_strided_slice %380 {offsets = [0, 128], sizes = [8, 128], strides = [1, 1]} : vector<8x384xf32> to vector<8x128xf32>
      %391 = arith.addf %389, %390 : vector<8x128xf32>
      %392 = arith.negf %391 : vector<8x128xf32>
      %393 = math.exp %392 : vector<8x128xf32>
      %cst_113 = arith.constant 1.000000e+00 : f32
      %394 = vector.broadcast %cst_113 : f32 to vector<8x128xf32>
      %395 = arith.addf %394, %393 : vector<8x128xf32>
      %396 = arith.divf %394, %395 : vector<8x128xf32>
      %397 = vector.extract_strided_slice %376 {offsets = [0, 256], sizes = [8, 128], strides = [1, 1]} : vector<8x384xf32> to vector<8x128xf32>
      %398 = vector.extract_strided_slice %380 {offsets = [0, 256], sizes = [8, 128], strides = [1, 1]} : vector<8x384xf32> to vector<8x128xf32>
      %399 = arith.mulf %388, %398 : vector<8x128xf32>
      %400 = arith.addf %397, %399 : vector<8x128xf32>
      %401 = math.tanh %400 : vector<8x128xf32>
      %cst_114 = arith.constant 1.000000e+00 : f32
      %402 = vector.broadcast %cst_114 : f32 to vector<8x128xf32>
      %403 = arith.subf %402, %396 : vector<8x128xf32>
      %404 = arith.mulf %403, %401 : vector<8x128xf32>
      %405 = arith.mulf %396, %371 : vector<8x128xf32>
      %406 = arith.addf %404, %405 : vector<8x128xf32>
      %407 = vector.broadcast %372 : i32 to vector<8x1xi32>
      %408 = arith.cmpi slt, %407, %25 : vector<8x1xi32>
      %cst_115 = arith.constant 0.000000e+00 : f32
      %409 = vector.shape_cast %408 : vector<8x1xi1> to vector<8x1xi1>
      %410 = vector.broadcast %409 : vector<8x1xi1> to vector<8x128xi1>
      %411 = vector.broadcast %cst_115 : f32 to vector<8x128xf32>
      %412 = arith.select %410, %406, %411 : vector<8x128xi1>, vector<8x128xf32>
      %413 = arith.index_cast %c7_i32 : i32 to index
      %c0_116 = arith.constant 0 : index
      %c0_117 = arith.constant 0 : index
      %414 = vector.load %arg17[%413, %c0_116, %c0_117] : memref<16x8x128xf32, #tpu.memory_space<vmem>>, vector<1x8x128xf32>
      %415 = vector.shape_cast %414 : vector<1x8x128xf32> to vector<8x128xf32>
      %416 = vector.shape_cast %412 : vector<8x128xf32> to vector<1x8x128xf32>
      tpu.vector_store %arg17[%413, %c0_116, %c0_117], %416 {strides = array<i32>} : memref<16x8x128xf32, #tpu.memory_space<vmem>>, vector<1x8x128xf32>,
      %417 = vector.shape_cast %408 : vector<8x1xi1> to vector<8x1xi1>
      %418 = vector.broadcast %417 : vector<8x1xi1> to vector<8x128xi1>
      %419 = arith.select %418, %406, %371 : vector<8x128xi1>, vector<8x128xf32>
      %c8_i32 = arith.constant 8 : i32
      %c0_118 = arith.constant 0 : index
      %c0_119 = arith.constant 0 : index
      %c0_120 = arith.constant 0 : index
      %420 = vector.load %arg17[%c0_118, %c0_119, %c0_120] : memref<16x8x128xf32, #tpu.memory_space<vmem>>, vector<16x8x128xf32>
      %421 = tpu.transpose %420, [1, 0, 2] : vector<16x8x128xf32> -> vector<8x16x128xf32>
      %422 = arith.truncf %421 : vector<8x16x128xf32> to vector<8x16x128xbf16>
      %c0_121 = arith.constant 0 : index
      %c0_122 = arith.constant 0 : index
      %c0_123 = arith.constant 0 : index
      %423 = vector.load %arg15[%c0_121, %c0_122, %c0_123] : memref<8x16x128xbf16, #tpu.memory_space<vmem>>, vector<8x16x128xbf16>
      tpu.vector_store %arg15[%c0_121, %c0_122, %c0_123], %422 {strides = array<i32>} : memref<8x16x128xbf16, #tpu.memory_space<vmem>>, vector<8x16x128xbf16>,
    } else {
    }
    %c0 = arith.constant 0 : index
    %c0_1 = arith.constant 0 : index
    %c0_2 = arith.constant 0 : index
    %3 = vector.load %arg15[%c0, %c0_1, %c0_2] : memref<8x16x128xbf16, #tpu.memory_space<vmem>>, vector<8x16x128xbf16>
    %4 = vector.shape_cast %3 : vector<8x16x128xbf16> to vector<128x128xbf16>
    %c0_3 = arith.constant 0 : index
    %c0_4 = arith.constant 0 : index
    %5 = vector.load %arg12[%c0_3, %c0_4] : memref<128x128xbf16, #tpu.memory_space<vmem>>, vector<128x128xbf16>
    %cst = arith.constant dense<0.000000e+00> : vector<128x128xf32>
    %6 = tpu.matmul %4, %5, %cst {dimension_numbers = #tpu.dot_dimension_numbers<[1], [0], [0], [1], [0, 0, 1, 1], [], []>} : vector<128x128xbf16>, vector<128x128xbf16>, vector<128x128xf32> -> vector<128x128xf32>
    %c0_5 = arith.constant 0 : index
    %c0_6 = arith.constant 0 : index
    %7 = vector.load %arg13[%c0_5, %c0_6] : memref<1x128xf32, #tpu.memory_space<vmem>>, vector<1x128xf32>
    %8 = vector.broadcast %7 : vector<1x128xf32> to vector<128x128xf32>
    %9 = arith.addf %6, %8 : vector<128x128xf32>
    %10 = vector.shape_cast %9 : vector<128x128xf32> to vector<8x16x128xf32>
    %11 = vector.extract_strided_slice %10 {offsets = [0, 0, 0], sizes = [8, 8, 128], strides = [1, 1, 1]} : vector<8x16x128xf32> to vector<8x8x128xf32>
    %12 = arith.truncf %11 : vector<8x8x128xf32> to vector<8x8x128xbf16>
    %c0_7 = arith.constant 0 : index
    %c0_8 = arith.constant 0 : index
    %c0_9 = arith.constant 0 : index
    %13 = vector.load %arg14[%c0_7, %c0_8, %c0_9] : memref<8x8x128xbf16, #tpu.memory_space<vmem>>, vector<8x8x128xbf16>
    tpu.vector_store %arg14[%c0_7, %c0_8, %c0_9], %12 {strides = array<i32>} : memref<8x8x128xbf16, #tpu.memory_space<vmem>>, vector<8x8x128xbf16>,
    return
  }
  func.func @transform_0(%arg0: i32, %arg1: i32) -> (i32, i32) {
    %c0_i32 = arith.constant 0 : i32
    %c0_i32_0 = arith.constant 0 : i32
    return %arg0, %c0_i32 : i32, i32
  }
  func.func @transform_1(%arg0: i32, %arg1: i32) -> (i32, i32, i32) {
    %c0_i32 = arith.constant 0 : i32
    %c0_i32_0 = arith.constant 0 : i32
    %c0_i32_1 = arith.constant 0 : i32
    return %c0_i32, %arg0, %c0_i32_0 : i32, i32, i32
  }
  func.func @transform_2(%arg0: i32, %arg1: i32) -> (i32, i32) {
    %c0_i32 = arith.constant 0 : i32
    %c0_i32_0 = arith.constant 0 : i32
    return %arg0, %c0_i32 : i32, i32
  }
  func.func @transform_3(%arg0: i32, %arg1: i32) -> (i32, i32) {
    %c0_i32 = arith.constant 0 : i32
    %c0_i32_0 = arith.constant 0 : i32
    %c0_i32_1 = arith.constant 0 : i32
    return %c0_i32, %c0_i32_0 : i32, i32
  }
  func.func @transform_4(%arg0: i32, %arg1: i32) -> (i32, i32) {
    %c0_i32 = arith.constant 0 : i32
    %c0_i32_0 = arith.constant 0 : i32
    %c0_i32_1 = arith.constant 0 : i32
    return %c0_i32, %c0_i32_0 : i32, i32
  }
  func.func @transform_5(%arg0: i32, %arg1: i32) -> (i32, i32) {
    %c0_i32 = arith.constant 0 : i32
    %c0_i32_0 = arith.constant 0 : i32
    %c0_i32_1 = arith.constant 0 : i32
    return %c0_i32, %c0_i32_0 : i32, i32
  }
  func.func @transform_6(%arg0: i32, %arg1: i32) -> (i32, i32) {
    %c0_i32 = arith.constant 0 : i32
    %c0_i32_0 = arith.constant 0 : i32
    %c0_i32_1 = arith.constant 0 : i32
    return %c0_i32, %c0_i32_0 : i32, i32
  }
  func.func @transform_7(%arg0: i32, %arg1: i32) -> (i32, i32) {
    %c0_i32 = arith.constant 0 : i32
    %c0_i32_0 = arith.constant 0 : i32
    %c0_i32_1 = arith.constant 0 : i32
    return %c0_i32, %c0_i32_0 : i32, i32
  }
  func.func @transform_8(%arg0: i32, %arg1: i32) -> (i32, i32) {
    %c0_i32 = arith.constant 0 : i32
    %c0_i32_0 = arith.constant 0 : i32
    %c0_i32_1 = arith.constant 0 : i32
    return %c0_i32, %c0_i32_0 : i32, i32
  }
  func.func @transform_9(%arg0: i32, %arg1: i32) -> (i32, i32) {
    %c0_i32 = arith.constant 0 : i32
    %c0_i32_0 = arith.constant 0 : i32
    %c0_i32_1 = arith.constant 0 : i32
    return %c0_i32, %c0_i32_0 : i32, i32
  }
  func.func @transform_10(%arg0: i32, %arg1: i32) -> (i32, i32) {
    %c0_i32 = arith.constant 0 : i32
    %c0_i32_0 = arith.constant 0 : i32
    return %c0_i32, %arg1 : i32, i32
  }
  func.func @transform_11(%arg0: i32, %arg1: i32) -> (i32, i32) {
    %c0_i32 = arith.constant 0 : i32
    %c0_i32_0 = arith.constant 0 : i32
    return %c0_i32, %arg1 : i32, i32
  }
  func.func @transform_12(%arg0: i32, %arg1: i32) -> (i32, i32, i32) {
    %c0_i32 = arith.constant 0 : i32
    %c0_i32_0 = arith.constant 0 : i32
    return %arg0, %c0_i32, %arg1 : i32, i32, i32
  }
}

</mosaic_0001>

<bundles_post_ra>
// kernel: gru_decoder_forward.1
= control target key start
LH: loop header
LB: loop body
LE: loop exit
PB: predicated region body
PF: predicated region fallthrough
CT: control target
= control target key end

     0   :  { %v4184_v0 = vmov 0.0   ;;  %vm3105_vm0 = vmmov 0   ;;  %v4182_v3 = vmov 0   ;;  %vm58_vm1 = vcmask 261120   ;;  %s4169_s8 = inlined_call_operand.vmem [shape: f32[32,128], index: 8, kind: input, shape index: {}]   ;;  %s4170_s2 = inlined_call_operand.vmem [shape: f32[8,32], index: 2, kind: input, shape index: {}]   ;;  %s4171_s4 = inlined_call_operand.vmem [shape: f32[32,384], index: 4, kind: input, shape index: {}]   ;;  %s4172_s3 = inlined_call_operand.vmem [shape: bf16[16,384], index: 3, kind: input, shape index: {}]   ;;  %s4173_s1 = inlined_call_operand.vmem [shape: bf16[16,8,16], index: 1, kind: input, shape index: {}]   ;;  %s4174_s6 = inlined_call_operand.vmem [shape: bf16[128,384], index: 6, kind: input, shape index: {}]   ;;  %s4175_s0 = inlined_call_operand.vmem [shape: s32[8,1], index: 0, kind: input, shape index: {}]   ;;  %s4176_s9 = inlined_call_operand.vmem [shape: f32[1,128], index: 9, kind: input, shape index: {}]   ;;  %s4177_s5 = inlined_call_operand.vmem [shape: f32[1,384], index: 5, kind: input, shape index: {}]   ;;  %s4178_s7 = inlined_call_operand.vmem [shape: f32[1,384], index: 7, kind: input, shape index: {}]   ;;  %s4179_s10 = inlined_call_operand.vmem [shape: bf16[128,128], index: 10, kind: input, shape index: {}]   ;;  %s4180_s11 = inlined_call_operand.vmem [shape: f32[1,128], index: 11, kind: input, shape index: {}]   ;;  %s4181_s12 = inlined_call_operand.vmem [shape: bf16[8,8,128], index: 12, kind: output, shape index: {}]  }
   0x1   :  { %2689 = vmatprep.subr.mxu1 %v4184_v0  ;;  %v50_v1 = vld [vmem:[%s4169_s8 + $0x18] sm:$0xff]  ;;  %v49_v2 = vld [vmem:[%s4169_s8 + $0x10] sm:$0xff]  ;;  %2697 = vmatprep.mubr.msk.f32.mxu1 %vm3105_vm0, %v4184_v0  ;;  %v48_v4 = vld [vmem:[%s4169_s8 + $0x8] sm:$0xff]  ;;  %vm396_vm2 = vcmask 130048   ;;  %v146_v62 = vlaneseq }
   0x2   :  { %2690 = vmatpush3.msra.mxu1 %v50_v1  ;;  %2926 = vset.pattern.permute.xlu0 %v4182_v3  ;;  %v47_v5 = vld [vmem:[%s4169_s8] sm:$0xff]  ;;  %v142_v7 = vld [vmem:[%s4171_s4 + $0x50] sm:$0xff]  ;;  %v141_v8 = vld [vmem:[%s4171_s4 + $0x48] sm:$0xff] }
   0x3   :  { %2691 = vmatprep.subr.mxu1 %v4184_v0  ;;  %2927 = vset.pattern.permute.xlu1 %v4182_v3  ;;  %v46_v6 = vld [vmem:[%s4170_s2] sm:$0xff]  ;;  %v139_v9 = vld [vmem:[%s4171_s4 + $0x38] sm:$0xff]  ;;  %v138_v10 = vld [vmem:[%s4171_s4 + $0x30] sm:$0xff] }
   0x4   :  { %2692 = vmatpush3.msra.mxu1 %v49_v2  ;;  %v136_v11 = vld [vmem:[%s4171_s4 + $0x20] sm:$0xff]  ;;  %v135_v12 = vld [vmem:[%s4171_s4 + $0x18] sm:$0xff]  ;;  %v133_v14 = vld [vmem:[%s4171_s4 + $0x8] sm:$0xff]  ;;  %v3485_v2 = vshrl.u32 %v146_v62, 7 }
   0x5   :  { %2693 = vmatprep.subr.mxu1 %v4184_v0  ;;  %v2931_v13 = vld [vmem:[%s4173_s1] sm:$0xff]   ;;  %v2934_v15 = vld [vmem:[%s4172_s3 + $0x8] ss:$12 sps:$4 sm:$0xff]   ;;  %v3233_v17 = vld [vmem:[%s4174_s6 + $0xac] ss:$12 sps:$4 sm:$0xff]  }
   0x6   :  { %2694 = vmatpush3.msra.mxu1 %v48_v4  ;;  %2713 = vmatprep.mubr.msk.bf16.mxu0 %vm396_vm2, %v2931_v13  ;;  %v132_v16 = vld [vmem:[%s4171_s4] sm:$0xff]  ;;  %v143_v18 = vld [vmem:[%s4171_s4 + $0x58] sm:$0xff]  ;;  %v2932_v20 = vld [vmem:[%s4173_s1 + $0x8] sm:$0xff]  }
   0x7   :  { %2695 = vmatprep.subr.mxu1 %v4184_v0  ;;  %2711 = vmatprep.subr.bf16.mxu0 %v2934_v15  ;;  %v140_v19 = vld [vmem:[%s4171_s4 + $0x40] sm:$0xff]  ;;  %v3250_v21 = vld [vmem:[%s4173_s1 + $0x10] sm:$0xff]   ;;  %v137_v24 = vld [vmem:[%s4171_s4 + $0x28] sm:$0xff] }
   0x8   :  { %2696 = vmatpush3.msra.mxu1 %v47_v5  ;;  %2712 = vmatpush3.bf16.msra.mxu0 %v2934_v15  ;;  %v3255_v22 = vld [vmem:[%s4174_s6 + $0xa8] ss:$12 sps:$4 sm:$0xff]   ;;  %v2930_v26 = vld [vmem:[%s4172_s3 + $0x4] ss:$12 sps:$4 sm:$0xff]   ;;  %v2928_v27 = vld [vmem:[%s4172_s3] ss:$12 sps:$4 sm:$0xff]  }
   0x9   :  { %2698 = vmatmul.mubr.msk.f32.vlgmr.msra.gmra.mxu1 %vm58_vm1, %v46_v6  ;;  %185 = vmatprep.subr.mxu1 %v142_v7  ;;  %v3262_v23 = vld [vmem:[%s4174_s6 + $0x94] ss:$12 sps:$4 sm:$0xff]   ;;  %v3287_v28 = vld [vmem:[%s4173_s1 + $0x18] sm:$0xff]   ;;  %v3324_v34 = vld [vmem:[%s4174_s6 + $0x64] ss:$12 sps:$4 sm:$0xff]   ;;  %v4188_v5 = vsub.s32 0, %v3485_v2 }
   0xa   :  { %186 = vmatpush1.msra.mxu1 %v141_v8  ;;  %225 = vmatprep.mubr.f32.mxu1 %v4184_v0  ;;  %v134_v25 = vld [vmem:[%s4171_s4 + $0x10] sm:$0xff]  ;;  %v3298_v30 = vld [vmem:[%s4174_s6 + $0x7c] ss:$12 sps:$4 sm:$0xff]   ;;  %v2938_v31 = vld [vmem:[%s4173_s1 + $0x20] sm:$0xff]   ;;  %v4187_v8 = vsub.s32 1, %v3485_v2 }
   0xb   :  { %187 = vmatprep.subr.mxu1 %v139_v9  ;;  %830 = vmatprep.subr.bf16.mxu0 %v3233_v17  ;;  %v3292_v29 = vld [vmem:[%s4174_s6 + $0x90] ss:$12 sps:$4 sm:$0xff]   ;;  %v3316_v33 = vld [vmem:[%s4174_s6 + $0x78] ss:$12 sps:$4 sm:$0xff]   ;;  %v2947_v36 = vld [vmem:[%s4173_s1 + $0x28] sm:$0xff]  }
   0xc   :  { %188 = vmatpush1.msra.mxu1 %v138_v10  ;;  %2714 = vmatmul.mubr.msk.bf16.vlgmr.msra.gmra.mxu0 %vm396_vm2, %v2932_v20  ;;  %v3307_v32 = vld [vmem:[%s4174_s6 + $0xb0] ss:$12 sps:$4 sm:$0xff]   ;;  %v3331_v35 = vld [vmem:[%s4174_s6 + $0x98] ss:$12 sps:$4 sm:$0xff]   ;;  %v3340_v37 = vld [vmem:[%s4174_s6 + $0x60] ss:$12 sps:$4 sm:$0xff]  }
   0xd   :  { %189 = vmatprep.subr.mxu1 %v136_v11  ;;  %2717 = vmatprep.mubr.msk.bf16.mxu0 %vm396_vm2, %v3250_v21  ;;  %v2956_v38 = vld [vmem:[%s4173_s1 + $0x30] sm:$0xff]   ;;  %v3349_v39 = vld [vmem:[%s4174_s6 + $0x80] ss:$12 sps:$4 sm:$0xff]   ;;  %v2959_v44 = vld [vmem:[%s4173_s1 + $0x38] sm:$0xff]  }
   0xe   :  { %190 = vmatpush1.msra.mxu1 %v135_v12  ;;  %831 = vmatpush1.bf16.msra.mxu0 %v3255_v22  ;;  %v3355_v40 = vld [vmem:[%s4174_s6 + $0x4c] ss:$12 sps:$4 sm:$0xff]   ;;  %v3361_v41 = vld [vmem:[%s4174_s6 + $0x48] ss:$12 sps:$4 sm:$0xff]   ;;  %v3389_v45 = vld [vmem:[%s4174_s6 + $0x30] ss:$12 sps:$4 sm:$0xff]  }
   0xf   :  { %191 = vmatprep.subr.mxu1 %v133_v14  ;;  %832 = vmatprep.subr.bf16.mxu0 %v3262_v23  ;;  %v3372_v42 = vld [vmem:[%s4174_s6 + $0x34] ss:$12 sps:$4 sm:$0xff]   ;;  %v3395_v46 = vld [vmem:[%s4174_s6 + $0x1c] ss:$12 sps:$4 sm:$0xff]   ;;  %v3409_v48 = vld [vmem:[%s4174_s6 + $0x18] ss:$12 sps:$4 sm:$0xff]  }
  0x10   :  { %192 = vmatpush1.msra.mxu1 %v132_v16  ;;  %v3379_v43 = vld [vmem:[%s4174_s6 + $0x68] ss:$12 sps:$4 sm:$0xff]   ;;  %v3401_v47 = vld [vmem:[%s4174_s6 + $0x50] ss:$12 sps:$4 sm:$0xff]   ;;  %v3420_v49 = vld [vmem:[%s4174_s6 + $0x38] ss:$12 sps:$4 sm:$0xff]  }
  0x11   :  { %2700 = vmatprep.subr.mxu1 %v4184_v0  ;;  %2394 = vmatmul.mubr.msk.f32.vlgmr.msra.gmra.mxu1 %vm58_vm1, %v46_v6  ;;  %v3428_v50 = vld [vmem:[%s4174_s6 + $0x20] ss:$12 sps:$4 sm:$0xff]   ;;  %v3443_v51 = vld [vmem:[%s4174_s6 + $0x4] ss:$12 sps:$4 sm:$0xff]   ;;  %v3453_v53 = vld [vmem:[%s4174_s6 + $0x8] ss:$12 sps:$4 sm:$0xff]  }
  0x12   :  { %2701 = vmatpush3.msra.mxu1 %v143_v18  ;;  %2708 = vmatprep.mubr.msk.f32.mxu1 %vm3105_vm0, %v4184_v0  ;;  %v3448_v52 = vld [vmem:[%s4174_s6] ss:$12 sps:$4 sm:$0xff]  }
  0x13   :  { %2702 = vmatprep.subr.mxu1 %v4184_v0  ;;  %833 = vmatpush1.bf16.msra.mxu0 %v3292_v29  ;;  %v3465_v54 = vld [vmem:[%s4175_s0] sm:$0xff] }
  0x14   :  { %2703 = vmatpush3.msra.mxu1 %v140_v19  ;;  %2718 = vmatmul.mubr.msk.bf16.gmra.mxu0 %vm396_vm2, %v3287_v28  ;;  %vm932_vm3 = vcmp.gt.s32.totalorder %v3465_v54, 0  ;;  %vm1051_vm4 = vcmp.gt.s32.totalorder %v3465_v54, 1  ;;  %vm1411_vm5 = vcmp.gt.s32.totalorder %v3465_v54, 4  ;;  %vm1651_vm6 = vcmp.gt.s32.totalorder %v3465_v54, 6  ;;  %v2392_v59 = vld [vmem:[%s4176_s9] ss:$0 sm:$0xff] }
  0x15   :  { %2704 = vmatprep.subr.mxu1 %v4184_v0  ;;  %2721 = vmatprep.mubr.msk.bf16.mxu0 %vm396_vm2, %v2938_v31  ;;  %v933_v55 = vsel %vm932_vm3, 1, %v4182_v3  ;;  %v1052_v56 = vsel %vm1051_vm4, 1, %v4182_v3  ;;  %v1412_v57 = vsel %vm1411_vm5, 1, %v4182_v3  ;;  %v1652_v58 = vsel %vm1651_vm6, 1, %v4182_v3  ;;  %v144_v7 = vld [vmem:[%s4177_s5] sm:$0x7] }
  0x16   :  { %2705 = vmatpush3.msra.mxu1 %v137_v24  ;;  %834 = vmatprep.subr.bf16.mxu0 %v3298_v30  ;;  %v149_v12 = vrot.slane %v144_v7, %v4188_v5  ;;  %v153_v14 = vrot.slane %v144_v7, %v4187_v8  ;;  %vm1171_vm8 = vcmp.gt.s32.totalorder %v3465_v54, 2  ;;  %vm1291_vm9 = vcmp.gt.s32.totalorder %v3465_v54, 3 }
  0x17   :  { %2706 = vmatprep.subr.mxu1 %v4184_v0  ;;  %835 = vmatpush1.bf16.msra.mxu0 %v3316_v33  ;;  %vm1531_vm10 = vcmp.gt.s32.totalorder %v3465_v54, 5  ;;  %vm1771_vm11 = vcmp.gt.s32.totalorder %v3465_v54, 7 }
  0x18   :  { %2707 = vmatpush3.msra.mxu1 %v134_v25  ;;  %836 = vmatprep.subr.bf16.mxu0 %v3324_v34 }
  0x19   :  { %2709 = vmatmul.mubr.msk.f32.vlgmr.msra.gmra.mxu1 %vm58_vm1, %v46_v6  ;;  %435 = vmatprep.subr.bf16.mxu1 %v2930_v26  ;;  %v4186_v6 = vsub.s32 2, %v3485_v2 }
  0x1a   :  { %436 = vmatpush1.bf16.msra.mxu1 %v2928_v27  ;;  %453 = vmatprep.mubr.bf16.mxu1 %v4182_v3 }
  0x1b   :  { %2729 = vmatprep.subr.bf16.mxu1 %v4184_v0  ;;  %837 = vmatpush1.bf16.msra.mxu0 %v3340_v37 }
  0x1c   :  { %2722 = vmatmul.mubr.msk.bf16.gmra.mxu0 %vm396_vm2, %v2947_v36  ;;  %838 = vmatprep.subr.bf16.mxu0 %v3355_v40 }
  0x1d   :  { %2407 = vmatmul.mubr.msk.bf16.vlgmr.msra.gmra.mxu1 %vm396_vm2, %v2931_v13  ;;  %2725 = vmatprep.mubr.msk.bf16.mxu0 %vm396_vm2, %v2956_v38  ;;  %v157_v13 = vrot.slane %v144_v7, %v4186_v6 }
  0x1e   :  { %463 = vmatprep.mubr.bf16.mxu1 %v4182_v3  ;;  %2730 = vmatpush3.bf16.msra.mxu1 %v3307_v32 }
  0x1f   :  { %2731 = vmatprep.subr.bf16.mxu1 %v4184_v0  ;;  %839 = vmatpush1.bf16.msra.mxu0 %v3361_v41 }
  0x20   :  { %840 = vmatprep.subr.bf16.mxu0 %v3372_v42  ;;  %935 = vperm.xlu0 %2926, %v933_v55  }
  0x22   :  { %2732 = vmatpush3.bf16.msra.mxu1 %v3331_v35 }
  0x23   :  { %2733 = vmatprep.subr.bf16.mxu1 %v4184_v0  ;;  %841 = vmatpush1.bf16.msra.mxu0 %v3389_v45 }
  0x24   :  { %2726 = vmatmul.mubr.msk.bf16.gmra.mxu0 %vm396_vm2, %v2959_v44  ;;  %842 = vmatprep.subr.bf16.mxu0 %v3395_v46 }
  0x25   :  { %2408 = vmatmul.mubr.msk.bf16.gmra.mxu1 %vm396_vm2, %v2932_v20  ;;  %862 = vmatprep.mubr.bf16.mxu0 %v4182_v3 }
  0x26   :  { %473 = vmatprep.mubr.bf16.mxu1 %v4182_v3  ;;  %2734 = vmatpush3.bf16.msra.mxu1 %v3349_v39 }
  0x27   :  { %2735 = vmatprep.subr.bf16.mxu1 %v4184_v0  ;;  %843 = vmatpush1.bf16.msra.mxu0 %v3409_v48 }
  0x28   :  { %844 = vmatprep.subr.bf16.mxu0 %v3443_v51  ;;  %1054 = vperm.xlu0 %2926, %v1052_v56  }
  0x2a   :  { %2736 = vmatpush3.bf16.msra.mxu1 %v3379_v43 }
  0x2b   :  { %2737 = vmatprep.subr.bf16.mxu1 %v4184_v0  ;;  %845 = vmatpush1.bf16.msra.mxu0 %v3448_v52 }
  0x2c   :  { %949 = vmatprep.subr.bf16.mxu0 %v3233_v17  ;;  %1414 = vperm.xlu0 %2926, %v1412_v57  }
  0x2d   :  { %2409 = vmatmul.mubr.msk.bf16.gmra.mxu1 %vm396_vm2, %v3250_v21 }
  0x2e   :  { %483 = vmatprep.mubr.bf16.mxu1 %v4182_v3  ;;  %2738 = vmatpush3.bf16.msra.mxu1 %v3401_v47 }
  0x2f   :  { %2739 = vmatprep.subr.bf16.mxu1 %v4184_v0 }
  0x30   :  { %1654 = vperm.xlu0 %2926, %v1652_v58  }
  0x32   :  { %2740 = vmatpush3.bf16.msra.mxu1 %v3420_v49 }
  0x33   :  { %2741 = vmatprep.subr.bf16.mxu1 %v4184_v0 }
  0x35   :  { %2410 = vmatmul.mubr.msk.bf16.gmra.mxu1 %vm396_vm2, %v3287_v28 }
  0x36   :  { %493 = vmatprep.mubr.bf16.mxu1 %v4182_v3  ;;  %2742 = vmatpush3.bf16.msra.mxu1 %v3428_v50 }
  0x37   :  { %2743 = vmatprep.subr.bf16.mxu1 %v4184_v0 }
  0x3a   :  { %2744 = vmatpush3.bf16.msra.mxu1 %v3453_v53 }
  0x3b   :  { %2749 = vmatprep.subr.bf16.mxu1 %v4184_v0 }
  0x3d   :  { %2411 = vmatmul.mubr.msk.bf16.gmra.mxu1 %vm396_vm2, %v2938_v31 }
  0x3e   :  { %503 = vmatprep.mubr.bf16.mxu1 %v4182_v3 }
  0x45   :  { %2412 = vmatmul.mubr.msk.bf16.gmra.mxu1 %vm396_vm2, %v2947_v36 }
  0x46   :  { %513 = vmatprep.mubr.bf16.mxu1 %v4182_v3 }
  0x4d   :  { %2413 = vmatmul.mubr.msk.bf16.gmra.mxu1 %vm396_vm2, %v2956_v38 }
  0x4e   :  { %523 = vmatprep.mubr.bf16.mxu1 %v4182_v3 }
  0x55   :  { %2414 = vmatmul.mubr.msk.bf16.gmra.mxu1 %vm396_vm2, %v2959_v44 }
  0x56   :  { %2745 = vmatprep.mubr.msk.bf16.mxu1 %vm3105_vm0, %v4184_v0 }
  0xc9   :  { %v128_v60 = vpop.f32.mrf.mxu1 }
  0xca   :  { %v3481_v61 = vadd.f32 %v2392_v59, %v128_v60 }
  0xcb   :  { %v2699_v63 = vpop.f32.mrf.mxu1 }
  0xcc   :  { %v685_v1 = vpack.c.bf16 %v3481_v61, %v3481_v61  ;;  %v2715_v9 = vpop.f32.mrf.mxu0 }
  0xce   :  { %863 = vmatmul.mubr.bf16.vlgmr.msra.gmra.mxu0 %v685_v1  ;;  %2746 = vmatmul.mubr.bf16.vlgmr.msra.gmra.mxu1 %v685_v1  ;;  %v568_v11 = vpop.f32.mrf.mxu0 }
  0xcf   :  { %950 = vmatpush1.bf16.msra.mxu0 %v3255_v22  ;;  %2750 = vmatpush3.bf16.msra.mxu1 %v3307_v32 }
  0xd0   :  { %951 = vmatprep.subr.bf16.mxu0 %v3262_v23  ;;  %2751 = vmatprep.subr.bf16.mxu1 %v4184_v0  ;;  %v2716_v15 = vpop.f32.mrf.mxu0 }
  0xd1   :  { %v227_v4 = vpop.f32.mrf.mxu1  ;;  %981 = vmatprep.mubr.bf16.mxu0 %v4182_v3  ;;  %2765 = vmatprep.mubr.msk.bf16.mxu1 %vm3105_vm0, %v4184_v0 }
  0xd2   :  { %v571_v18 = vpop.f32.mrf.mxu0  ;;  %v3514_v19 = vadd.f32 %v227_v4, %v149_v12 }
  0xd3   :  { %952 = vmatpush1.bf16.msra.mxu0 %v3292_v29  ;;  %2752 = vmatpush3.bf16.msra.mxu1 %v3331_v35  ;;  %v229_v10 = vpop.f32.mrf.mxu1 }
  0xd4   :  { %953 = vmatprep.subr.bf16.mxu0 %v3298_v30  ;;  %2753 = vmatprep.subr.bf16.mxu1 %v4184_v0  ;;  %v3516_v21 = vadd.f32 %v229_v10, %v153_v14  ;;  %v2719_v25 = vpop.f32.mrf.mxu0 }
  0xd6   :  { %v584_v44 = vpop.f32.mrf.mxu0 }
  0xd7   :  { %954 = vmatpush1.bf16.msra.mxu0 %v3316_v33  ;;  %2754 = vmatpush3.bf16.msra.mxu1 %v3349_v39 }
  0xd8   :  { %955 = vmatprep.subr.bf16.mxu0 %v3324_v34  ;;  %2755 = vmatprep.subr.bf16.mxu1 %v4184_v0  ;;  %v2720_v58 = vpop.f32.mrf.mxu0 }
  0xd9   :  { %v298_v16 = vpop.f32.mrf.mxu1 }
  0xda   :  { %v299_v20 = vadd.f32 %v298_v16, %v157_v13  ;;  %v587_v63 = vpop.f32.mrf.mxu0 }
  0xdb   :  { %v2710_v24 = vpop.f32.mrf.mxu1  ;;  %956 = vmatpush1.bf16.msra.mxu0 %v3340_v37  ;;  %2756 = vmatpush3.bf16.msra.mxu1 %v3379_v43 }
  0xdc   :  { %v3520_v26 = vadd.f32 %v2715_v9, %v299_v20  ;;  %v3522_v27 = vadd.f32 %v568_v11, %v299_v20  ;;  %v3524_v28 = vadd.f32 %v2716_v15, %v299_v20  ;;  %v3526_v31 = vadd.f32 %v571_v18, %v299_v20  ;;  %957 = vmatprep.subr.bf16.mxu0 %v3355_v40  ;;  %v2723_v9 = vpop.f32.mrf.mxu0 }
  0xdd   :  { %v455_v36 = vpop.f32.mrf.mxu1  ;;  %v3529_v38 = vadd.f32 %v2719_v25, %v299_v20  ;;  %2757 = vmatprep.subr.bf16.mxu1 %v4184_v0  ;;  %v3535_v56 = vadd.f32 %v584_v44, %v299_v20  ;;  %v3542_v60 = vadd.f32 %v2720_v58, %v299_v20  ;;  %v3549_v4 = vadd.f32 %v587_v63, %v299_v20 }
  0xde   :  { %v3533_v55 = vadd.f32 %v455_v36, %v3514_v19  ;;  %v600_v12 = vpop.f32.mrf.mxu0 }
  0xdf   :  { %4189 = vst [vmem:[#allocation5_spill] sm:$0xff] %v3529_v38  ;;  %v457_v57 = vpop.f32.mrf.mxu1  ;;  %958 = vmatpush1.bf16.msra.mxu0 %v3361_v41  ;;  %2758 = vmatpush3.bf16.msra.mxu1 %v3401_v47  ;;  %4190 = vst [vmem:[#allocation6_spill] sm:$0xff] %v3542_v60 }
  0xe0   :  { %v3540_v59 = vadd.f32 %v457_v57, %v3516_v21  ;;  %959 = vmatprep.subr.bf16.mxu0 %v3372_v42  ;;  %2759 = vmatprep.subr.bf16.mxu1 %v4184_v0  ;;  %4191 = vst [vmem:[#allocation7_spill] sm:$0xff] %v3549_v4  ;;  %v2724_v15 = vpop.f32.mrf.mxu0 }
  0xe1   :  { %v459_v62 = vpop.f32.mrf.mxu1 }
  0xe2   :  { %v3547_v1 = vadd.f32 %v459_v62, %v3514_v19  ;;  %v603_v20 = vpop.f32.mrf.mxu0 }
  0xe3   :  { %v461_v7 = vpop.f32.mrf.mxu1  ;;  %960 = vmatpush1.bf16.msra.mxu0 %v3389_v45  ;;  %2760 = vmatpush3.bf16.msra.mxu1 %v3420_v49 }
  0xe4   :  { %v3554_v10 = vadd.f32 %v461_v7, %v3516_v21  ;;  %961 = vmatprep.subr.bf16.mxu0 %v3395_v46  ;;  %2761 = vmatprep.subr.bf16.mxu1 %v4184_v0  ;;  %v2727_v36 = vpop.f32.mrf.mxu0 }
  0xe5   :  { %v465_v11 = vpop.f32.mrf.mxu1 }
  0xe6   :  { %v3559_v13 = vadd.f32 %v465_v11, %v3514_v19  ;;  %v616_v58 = vpop.f32.mrf.mxu0 }
  0xe7   :  { %v467_v14 = vpop.f32.mrf.mxu1  ;;  %962 = vmatpush1.bf16.msra.mxu0 %v3409_v48  ;;  %2762 = vmatpush3.bf16.msra.mxu1 %v3428_v50 }
  0xe8   :  { %v3564_v16 = vadd.f32 %v467_v14, %v3516_v21  ;;  %963 = vmatprep.subr.bf16.mxu0 %v3443_v51  ;;  %2763 = vmatprep.subr.bf16.mxu1 %v4184_v0  ;;  %v2728_v7 = vpop.f32.mrf.mxu0 }
  0xe9   :  { %v469_v18 = vpop.f32.mrf.mxu1 }
  0xea   :  { %v3569_v24 = vadd.f32 %v469_v18, %v3514_v19  ;;  %v619_v12 = vpop.f32.mrf.mxu0 }
  0xeb   :  { %v471_v25 = vpop.f32.mrf.mxu1  ;;  %964 = vmatpush1.bf16.msra.mxu0 %v3448_v52  ;;  %2764 = vmatpush3.bf16.msra.mxu1 %v3453_v53 }
  0xec   :  { %v3574_v44 = vadd.f32 %v471_v25, %v3516_v21  ;;  %1069 = vmatprep.subr.bf16.mxu0 %v3233_v17  ;;  %2769 = vmatprep.subr.bf16.mxu1 %v4184_v0 }
  0xed   :  { %v475_v57 = vpop.f32.mrf.mxu1 }
  0xee   :  { %v3579_v62 = vadd.f32 %v475_v57, %v3514_v19 }
  0xef   :  { %v477_v63 = vpop.f32.mrf.mxu1 }
  0xf0   :  { %v3582_v9 = vadd.f32 %v477_v63, %v3516_v21 }
  0xf1   :  { %v479_v11 = vpop.f32.mrf.mxu1 }
  0xf2   :  { %v3585_v14 = vadd.f32 %v479_v11, %v3514_v19 }
  0xf3   :  { %v481_v15 = vpop.f32.mrf.mxu1 }
  0xf4   :  { %v3588_v18 = vadd.f32 %v481_v15, %v3516_v21 }
  0xf5   :  { %v485_v20 = vpop.f32.mrf.mxu1 }
  0xf6   :  { %v3591_v25 = vadd.f32 %v485_v20, %v3514_v19 }
  0xf7   :  { %v487_v36 = vpop.f32.mrf.mxu1 }
  0xf8   :  { %4192 = vst [vmem:[#allocation8_spill] sm:$0xff] %v3591_v25  ;;  %v3594_v57 = vadd.f32 %v487_v36, %v3516_v21 }
  0xf9   :  { %v489_v58 = vpop.f32.mrf.mxu1 }
  0xfa   :  { %4193 = vst [vmem:[#allocation9_spill] sm:$0xff] %v3594_v57  ;;  %v3597_v63 = vadd.f32 %v489_v58, %v3514_v19 }
  0xfb   :  { %v491_v7 = vpop.f32.mrf.mxu1 }
  0xfc   :  { %4194 = vst [vmem:[#allocation10_spill] sm:$0xff] %v3597_v63  ;;  %v3600_v11 = vadd.f32 %v491_v7, %v3516_v21  ;;  %v339_v21 = vld [vmem:[%s4178_s7] sm:$0x7] }
  0xfd   :  { %v495_v12 = vpop.f32.mrf.mxu1 }
  0xfe   :  { %4195 = vst [vmem:[#allocation11_spill] sm:$0xff] %v3600_v11 }
  0xff   :  { %v497_v3 = vpop.f32.mrf.mxu1 }
 0x100   :  { %v4196_v3 = vsub.s32 0, %v3485_v2 }
 0x101   :  { %v499_v15 = vpop.f32.mrf.mxu1 }
 0x102   :  { %v3607_v7 = vrot.slane %v339_v21, %v4196_v3 }
 0x103   :  { %v501_v0 = vpop.f32.mrf.mxu1 }
 0x105   :  { %v505_v6 = vpop.f32.mrf.mxu1 }
 0x107   :  { %v507_v8 = vpop.f32.mrf.mxu1 }
 0x109   :  { %v509_v20 = vpop.f32.mrf.mxu1 }
 0x10b   :  { %v511_v5 = vpop.f32.mrf.mxu1 }
 0x10c   :  { %v4197_v5 = vsub.s32 1, %v3485_v2 }
 0x10d   :  { %v515_v60 = vpop.f32.mrf.mxu1 }
 0x10e   :  { %v3611_v8 = vrot.slane %v339_v21, %v4197_v5 }
 0x10f   :  { %v517_v38 = vpop.f32.mrf.mxu1 }
 0x111   :  { %v519_v36 = vpop.f32.mrf.mxu1 }
 0x113   :  { %v521_v57 = vpop.f32.mrf.mxu1 }
 0x115   :  { %v525_v25 = vpop.f32.mrf.mxu1 }
 0x117   :  { %v527_v4 = vpop.f32.mrf.mxu1 }
 0x119   :  { %v529_v19 = vpop.f32.mrf.mxu1 }
 0x11b   :  { %v531_v58 = vpop.f32.mrf.mxu1 }
 0x18e   :  { %v864_v0 = vpop.f32.mrf.mxu0  ;;  %v905_v6 = vpop.f32.mrf.mxu1 }
 0x18f   :  { %v865_v38 = vadd.f32 %v864_v0, %v3607_v7 }
 0x190   :  { %v866_v60 = vpop.f32.mrf.mxu0  ;;  %v2747_v4 = vpop.f32.mrf.mxu1 }
 0x191   :  { %v911_v25 = vadd.f32 %v865_v38, %v3533_v55  ;;  %v867_v20 = vadd.f32 %v866_v60, %v3611_v8  ;;  %v4198_v4 = vsub.s32 2, %v3485_v2 }
 0x192   :  { %v868_v57 = vpop.f32.mrf.mxu0  ;;  %v908_v12 = vpop.f32.mrf.mxu1 }
 0x193   :  { %v2447_v15 = vmul.f32 -1.442695, %v911_v25  ;;  %v918_v58 = vadd.f32 %v867_v20, %v3540_v59  ;;  %v3619_v63 = vrot.slane %v339_v21, %v4198_v4 }
 0x194   :  { %v869_v36 = vpop.f32.mrf.mxu0  ;;  %v2748_v19 = vpop.f32.mrf.mxu1 }
 0x195   :  { %3000 = vpow2.f32 %v2447_v15  ;;  %v2448_v3 = vmul.f32 -1.442695, %v918_v58  ;;  %v906_v38 = vadd.f32 %v905_v6, %v3619_v63  ;;  %v936_v36 = vpop.permute.xlu0 %935 }
 0x196   :  { %vm937_vm7 = vcmp.eq.s32.totalorder %v936_v36, 1 }
 0x197   :  { %3002 = vpow2.f32 %v2448_v3  ;;  %v4200_v3 = vmov 0  }
 0x198   :  { %v1772_v4 = vsel %vm1771_vm11, 1, %v4200_v3 }
 0x1a2   :  { %v3001_v5 = vpop.eup %3000 }
 0x1a3   :  { %v915_v11 = vadd.f32 1.0, %v3001_v5  ;;  %v1292_v5 = vsel %vm1291_vm9, 1, %v4200_v3 }
 0x1a4   :  { %v3003_v0 = vpop.eup %3002 }
 0x1a5   :  { %3004 = vrcp.f32 %v915_v11  ;;  %v922_v55 = vadd.f32 1.0, %v3003_v0  ;;  %v1532_v0 = vsel %vm1531_vm10, 1, %v4200_v3 }
 0x1a7   :  { %3006 = vrcp.f32 %v922_v55 }
 0x1b2   :  { %v3005_v25 = vpop.eup %3004 }
 0x1b3   :  { %v925_v60 = vmul.f32 %v3005_v25, %v906_v38 }
 0x1b4   :  { %v3007_v59 = vpop.eup %3006 }
 0x1b5   :  { %v926_v57 = vadd.f32 %v925_v60, %v3522_v27  ;;  %v928_v12 = vsub.f32 1.0, %v3007_v59  ;;  %v930_v11 = vmul.f32 %v3007_v59, %v3481_v61  ;;  %v4199_v27 = vmov 0.0  }
 0x1b7   :  { %3008 = vtanh.f32 %v926_v57 }
 0x1c4   :  { %v3009_v15 = vpop.eup %3008 }
 0x1c5   :  { %v929_v20 = vmul.f32 %v3009_v15, %v928_v12 }
 0x1c7   :  { %v931_v19 = vadd.f32 %v930_v11, %v929_v20 }
 0x1c9   :  { %v3624_v21 = vsel %vm937_vm7, %v931_v19, 0.0  ;;  %v3627_v58 = vsel %vm937_vm7, %v931_v19, %v3481_v61  ;;  %v1172_v61 = vsel %vm1171_vm8, 1, %v4200_v3 }
 0x1ca   :  { %v948_v6 = vpack.c.bf16 %v3627_v58, %v3627_v58  ;;  %1174 = vperm.xlu1 %2927, %v1172_v61  }
 0x1cc   :  { %982 = vmatmul.mubr.bf16.vlgmr.msra.gmra.mxu0 %v948_v6  ;;  %2766 = vmatmul.mubr.bf16.vlgmr.msra.gmra.mxu1 %v948_v6 }
 0x1cd   :  { %1070 = vmatpush1.bf16.msra.mxu0 %v3255_v22  ;;  %2770 = vmatpush3.bf16.msra.mxu1 %v3307_v32 }
 0x1ce   :  { %1071 = vmatprep.subr.bf16.mxu0 %v3262_v23  ;;  %2771 = vmatprep.subr.bf16.mxu1 %v4199_v27 }
 0x1cf   :  { %1101 = vmatprep.mubr.bf16.mxu0 %v4200_v3  ;;  %2785 = vmatprep.mubr.msk.bf16.mxu1 %vm3105_vm0, %v4199_v27 }
 0x1d0   :  { %1294 = vperm.xlu1 %2927, %v1292_v5  }
 0x1d1   :  { %1072 = vmatpush1.bf16.msra.mxu0 %v3292_v29  ;;  %2772 = vmatpush3.bf16.msra.mxu1 %v3331_v35 }
 0x1d2   :  { %1073 = vmatprep.subr.bf16.mxu0 %v3298_v30  ;;  %2773 = vmatprep.subr.bf16.mxu1 %v4199_v27 }
 0x1d4   :  { %1534 = vperm.xlu1 %2927, %v1532_v0  }
 0x1d5   :  { %1074 = vmatpush1.bf16.msra.mxu0 %v3316_v33  ;;  %2774 = vmatpush3.bf16.msra.mxu1 %v3349_v39 }
 0x1d6   :  { %1075 = vmatprep.subr.bf16.mxu0 %v3324_v34  ;;  %2775 = vmatprep.subr.bf16.mxu1 %v4199_v27 }
 0x1d8   :  { %1774 = vperm.xlu1 %2927, %v1772_v4  }
 0x1d9   :  { %1076 = vmatpush1.bf16.msra.mxu0 %v3340_v37  ;;  %2776 = vmatpush3.bf16.msra.mxu1 %v3379_v43 }
 0x1da   :  { %1077 = vmatprep.subr.bf16.mxu0 %v3355_v40  ;;  %2777 = vmatprep.subr.bf16.mxu1 %v4199_v27 }
 0x1dd   :  { %1078 = vmatpush1.bf16.msra.mxu0 %v3361_v41  ;;  %2778 = vmatpush3.bf16.msra.mxu1 %v3401_v47 }
 0x1de   :  { %1079 = vmatprep.subr.bf16.mxu0 %v3372_v42  ;;  %2779 = vmatprep.subr.bf16.mxu1 %v4199_v27 }
 0x1e1   :  { %1080 = vmatpush1.bf16.msra.mxu0 %v3389_v45  ;;  %2780 = vmatpush3.bf16.msra.mxu1 %v3420_v49 }
 0x1e2   :  { %1081 = vmatprep.subr.bf16.mxu0 %v3395_v46  ;;  %2781 = vmatprep.subr.bf16.mxu1 %v4199_v27 }
 0x1e5   :  { %1082 = vmatpush1.bf16.msra.mxu0 %v3409_v48  ;;  %2782 = vmatpush3.bf16.msra.mxu1 %v3428_v50 }
 0x1e6   :  { %1083 = vmatprep.subr.bf16.mxu0 %v3443_v51  ;;  %2783 = vmatprep.subr.bf16.mxu1 %v4199_v27 }
 0x1e9   :  { %1084 = vmatpush1.bf16.msra.mxu0 %v3448_v52  ;;  %2784 = vmatpush3.bf16.msra.mxu1 %v3453_v53 }
 0x1ea   :  { %1189 = vmatprep.subr.bf16.mxu0 %v3233_v17  ;;  %2789 = vmatprep.subr.bf16.mxu1 %v4199_v27 }
 0x28c   :  { %v983_v55 = vpop.f32.mrf.mxu0  ;;  %v1024_v38 = vpop.f32.mrf.mxu1 }
 0x28d   :  { %v984_v25 = vadd.f32 %v983_v55, %v3607_v7  ;;  %v1025_v55 = vadd.f32 %v1024_v38, %v3619_v63 }
 0x28e   :  { %v985_v60 = vpop.f32.mrf.mxu0  ;;  %v2767_v57 = vpop.f32.mrf.mxu1 }
 0x28f   :  { %v1030_v59 = vadd.f32 %v984_v25, %v3547_v1  ;;  %v986_v11 = vadd.f32 %v985_v60, %v3611_v8 }
 0x290   :  { %v987_v12 = vpop.f32.mrf.mxu0  ;;  %v1027_v15 = vpop.f32.mrf.mxu1 }
 0x291   :  { %v2449_v20 = vmul.f32 -1.442695, %v1030_v59  ;;  %v1037_v54 = vadd.f32 %v986_v11, %v3554_v10 }
 0x292   :  { %v988_v36 = vpop.f32.mrf.mxu0  ;;  %v2768_v19 = vpop.f32.mrf.mxu1 }
 0x293   :  { %3010 = vpow2.f32 %v2449_v20  ;;  %v2450_v6 = vmul.f32 -1.442695, %v1037_v54  ;;  %v1055_v20 = vpop.permute.xlu0 %1054 }
 0x294   :  { %vm1056_vm12 = vcmp.eq.s32.totalorder %v1055_v20, 1 }
 0x295   :  { %3012 = vpow2.f32 %v2450_v6 }
 0x2a0   :  { %v3011_v61 = vpop.eup %3010 }
 0x2a1   :  { %v1034_v5 = vadd.f32 1.0, %v3011_v61 }
 0x2a2   :  { %v3013_v0 = vpop.eup %3012 }
 0x2a3   :  { %3014 = vrcp.f32 %v1034_v5  ;;  %v1041_v4 = vadd.f32 1.0, %v3013_v0 }
 0x2a5   :  { %3016 = vrcp.f32 %v1041_v4 }
 0x2b0   :  { %v3015_v1 = vpop.eup %3014 }
 0x2b1   :  { %v1044_v25 = vmul.f32 %v3015_v1, %v1025_v55 }
 0x2b2   :  { %v3017_v60 = vpop.eup %3016 }
 0x2b3   :  { %v1045_v57 = vadd.f32 %v1044_v25, %v3526_v31  ;;  %v1047_v59 = vsub.f32 1.0, %v3017_v60  ;;  %v1049_v10 = vmul.f32 %v3017_v60, %v3627_v58 }
 0x2b5   :  { %3018 = vtanh.f32 %v1045_v57 }
 0x2c2   :  { %v3019_v12 = vpop.eup %3018 }
 0x2c3   :  { %v1048_v15 = vmul.f32 %v3019_v12, %v1047_v59 }
 0x2c5   :  { %v1050_v11 = vadd.f32 %v1049_v10, %v1048_v15 }
 0x2c7   :  { %v3681_v36 = vsel %vm1056_vm12, %v1050_v11, 0.0  ;;  %v3684_v19 = vsel %vm1056_vm12, %v1050_v11, %v3627_v58 }
 0x2c8   :  { %v1068_v38 = vpack.c.bf16 %v3684_v19, %v3684_v19 }
 0x2ca   :  { %1102 = vmatmul.mubr.bf16.vlgmr.msra.gmra.mxu0 %v1068_v38  ;;  %2786 = vmatmul.mubr.bf16.vlgmr.msra.gmra.mxu1 %v1068_v38 }
 0x2cb   :  { %1190 = vmatpush1.bf16.msra.mxu0 %v3255_v22  ;;  %2790 = vmatpush3.bf16.msra.mxu1 %v3307_v32 }
 0x2cc   :  { %1191 = vmatprep.subr.bf16.mxu0 %v3262_v23  ;;  %2791 = vmatprep.subr.bf16.mxu1 %v4199_v27 }
 0x2cd   :  { %1221 = vmatprep.mubr.bf16.mxu0 %v4200_v3  ;;  %2805 = vmatprep.mubr.msk.bf16.mxu1 %vm3105_vm0, %v4199_v27 }
 0x2cf   :  { %1192 = vmatpush1.bf16.msra.mxu0 %v3292_v29  ;;  %2792 = vmatpush3.bf16.msra.mxu1 %v3331_v35 }
 0x2d0   :  { %1193 = vmatprep.subr.bf16.mxu0 %v3298_v30  ;;  %2793 = vmatprep.subr.bf16.mxu1 %v4199_v27 }
 0x2d3   :  { %1194 = vmatpush1.bf16.msra.mxu0 %v3316_v33  ;;  %2794 = vmatpush3.bf16.msra.mxu1 %v3349_v39 }
 0x2d4   :  { %1195 = vmatprep.subr.bf16.mxu0 %v3324_v34  ;;  %2795 = vmatprep.subr.bf16.mxu1 %v4199_v27 }
 0x2d7   :  { %1196 = vmatpush1.bf16.msra.mxu0 %v3340_v37  ;;  %2796 = vmatpush3.bf16.msra.mxu1 %v3379_v43 }
 0x2d8   :  { %1197 = vmatprep.subr.bf16.mxu0 %v3355_v40  ;;  %2797 = vmatprep.subr.bf16.mxu1 %v4199_v27 }
 0x2db   :  { %1198 = vmatpush1.bf16.msra.mxu0 %v3361_v41  ;;  %2798 = vmatpush3.bf16.msra.mxu1 %v3401_v47 }
 0x2dc   :  { %1199 = vmatprep.subr.bf16.mxu0 %v3372_v42  ;;  %2799 = vmatprep.subr.bf16.mxu1 %v4199_v27 }
 0x2df   :  { %1200 = vmatpush1.bf16.msra.mxu0 %v3389_v45  ;;  %2800 = vmatpush3.bf16.msra.mxu1 %v3420_v49 }
 0x2e0   :  { %1201 = vmatprep.subr.bf16.mxu0 %v3395_v46  ;;  %2801 = vmatprep.subr.bf16.mxu1 %v4199_v27 }
 0x2e3   :  { %1202 = vmatpush1.bf16.msra.mxu0 %v3409_v48  ;;  %2802 = vmatpush3.bf16.msra.mxu1 %v3428_v50 }
 0x2e4   :  { %1203 = vmatprep.subr.bf16.mxu0 %v3443_v51  ;;  %2803 = vmatprep.subr.bf16.mxu1 %v4199_v27 }
 0x2e7   :  { %1204 = vmatpush1.bf16.msra.mxu0 %v3448_v52  ;;  %2804 = vmatpush3.bf16.msra.mxu1 %v3453_v53 }
 0x2e8   :  { %1309 = vmatprep.subr.bf16.mxu0 %v3233_v17  ;;  %2809 = vmatprep.subr.bf16.mxu1 %v4199_v27 }
 0x38a   :  { %v1103_v31 = vpop.f32.mrf.mxu0  ;;  %v1144_v58 = vpop.f32.mrf.mxu1 }
 0x38b   :  { %v1104_v54 = vadd.f32 %v1103_v31, %v3607_v7  ;;  %v1145_v20 = vadd.f32 %v1144_v58, %v3619_v63 }
 0x38c   :  { %v1105_v6 = vpop.f32.mrf.mxu0  ;;  %v2787_v61 = vpop.f32.mrf.mxu1 }
 0x38d   :  { %v1150_v5 = vadd.f32 %v1104_v54, %v3559_v13  ;;  %v1106_v1 = vadd.f32 %v1105_v6, %v3611_v8  ;;  %v3107_v54 = vmov 1983009808  }
 0x38e   :  { %v1107_v0 = vpop.f32.mrf.mxu0  ;;  %v1147_v4 = vpop.f32.mrf.mxu1  ;;  %v1799_v6 = vunpack.c.l.s4 %v3107_v54 }
 0x38f   :  { %v2451_v55 = vmul.f32 -1.442695, %v1150_v5  ;;  %v1157_v17 = vadd.f32 %v1106_v1, %v3564_v16  ;;  %v1175_v0 = vpop.permute.xlu1 %1174 }
 0x390   :  { %v1108_v25 = vpop.f32.mrf.mxu0  ;;  %v2788_v57 = vpop.f32.mrf.mxu1  ;;  %v1800_v5 = vunpack.c.0.s8 %v1799_v6  ;;  %vm1176_vm13 = vcmp.eq.s32.totalorder %v1175_v0, 1  ;;  %v3108_v6 = vmov 1934713408  }
 0x391   :  { %3020 = vpow2.f32 %v2451_v55  ;;  %v2452_v60 = vmul.f32 -1.442695, %v1157_v17 }
 0x392   :  { %v3731_v58 = vsub.s32 %v1800_v5, %v3485_v2 }
 0x393   :  { %3022 = vpow2.f32 %v2452_v60  ;;  %v1295_v5 = vpop.permute.xlu1 %1294 }
 0x394   :  { %vm1296_vm14 = vcmp.eq.s32.totalorder %v1295_v5, 1 }
 0x39e   :  { %v3021_v59 = vpop.eup %3020 }
 0x39f   :  { %v1154_v12 = vadd.f32 1.0, %v3021_v59 }
 0x3a0   :  { %v3023_v15 = vpop.eup %3022 }
 0x3a1   :  { %3024 = vrcp.f32 %v1154_v12  ;;  %v1161_v10 = vadd.f32 1.0, %v3023_v15 }
 0x3a3   :  { %3026 = vrcp.f32 %v1161_v10 }
 0x3ae   :  { %v3025_v13 = vpop.eup %3024 }
 0x3af   :  { %v1164_v11 = vmul.f32 %v3025_v13, %v1145_v20 }
 0x3b0   :  { %v3027_v31 = vpop.eup %3026 }
 0x3b1   :  { %v1165_v38 = vadd.f32 %v1164_v11, %v3520_v26  ;;  %v1167_v61 = vsub.f32 1.0, %v3027_v31  ;;  %v1169_v55 = vmul.f32 %v3027_v31, %v3684_v19 }
 0x3b3   :  { %3028 = vtanh.f32 %v1165_v38 }
 0x3c0   :  { %v3029_v16 = vpop.eup %3028 }
 0x3c1   :  { %v1168_v4 = vmul.f32 %v3029_v16, %v1167_v61 }
 0x3c3   :  { %v1170_v1 = vadd.f32 %v1169_v55, %v1168_v4 }
 0x3c5   :  { %v1177_v25 = vsel %vm1176_vm13, %v1170_v1, 0.0  ;;  %v3734_v57 = vsel %vm1176_vm13, %v1170_v1, %v3684_v19 }
 0x3c6   :  { %v1188_v26 = vpack.c.bf16 %v3734_v57, %v3734_v57  ;;  %v1796_v17 = vcombine.low %v3624_v21, %v1177_v25  ;;  %v1797_v60 = vcombine.high %v3624_v21, %v1177_v25 }
 0x3c8   :  { %v3741_v59 = vrot.slane %v1796_v17, %v3731_v58  ;;  %v3744_v12 = vrot.slane %v1797_v60, %v3731_v58  ;;  %1222 = vmatmul.mubr.bf16.vlgmr.msra.gmra.mxu0 %v1188_v26  ;;  %2806 = vmatmul.mubr.bf16.vlgmr.msra.gmra.mxu1 %v1188_v26 }
 0x3c9   :  { %1310 = vmatpush1.bf16.msra.mxu0 %v3255_v22  ;;  %2810 = vmatpush3.bf16.msra.mxu1 %v3307_v32  ;;  %v3782_v22 = vld [vmem:[%s4174_s6 + $0xac] ss:$12 sps:$4 sm:$0xff]  }
 0x3ca   :  { %1311 = vmatprep.subr.bf16.mxu0 %v3262_v23  ;;  %2811 = vmatprep.subr.bf16.mxu1 %v4199_v27 }
 0x3cb   :  { %1341 = vmatprep.mubr.bf16.mxu0 %v4200_v3  ;;  %2825 = vmatprep.mubr.msk.bf16.mxu1 %vm3105_vm0, %v4199_v27 }
 0x3cd   :  { %1312 = vmatpush1.bf16.msra.mxu0 %v3292_v29  ;;  %2812 = vmatpush3.bf16.msra.mxu1 %v3331_v35 }
 0x3ce   :  { %1313 = vmatprep.subr.bf16.mxu0 %v3298_v30  ;;  %2813 = vmatprep.subr.bf16.mxu1 %v4199_v27 }
 0x3d1   :  { %1314 = vmatpush1.bf16.msra.mxu0 %v3316_v33  ;;  %2814 = vmatpush3.bf16.msra.mxu1 %v3349_v39 }
 0x3d2   :  { %1315 = vmatprep.subr.bf16.mxu0 %v3324_v34  ;;  %2815 = vmatprep.subr.bf16.mxu1 %v4199_v27 }
 0x3d5   :  { %1316 = vmatpush1.bf16.msra.mxu0 %v3340_v37  ;;  %2816 = vmatpush3.bf16.msra.mxu1 %v3379_v43 }
 0x3d6   :  { %1317 = vmatprep.subr.bf16.mxu0 %v3355_v40  ;;  %2817 = vmatprep.subr.bf16.mxu1 %v4199_v27 }
 0x3d9   :  { %1318 = vmatpush1.bf16.msra.mxu0 %v3361_v41  ;;  %2818 = vmatpush3.bf16.msra.mxu1 %v3401_v47 }
 0x3da   :  { %1319 = vmatprep.subr.bf16.mxu0 %v3372_v42  ;;  %2819 = vmatprep.subr.bf16.mxu1 %v4199_v27 }
 0x3dd   :  { %1320 = vmatpush1.bf16.msra.mxu0 %v3389_v45  ;;  %2820 = vmatpush3.bf16.msra.mxu1 %v3420_v49 }
 0x3de   :  { %1321 = vmatprep.subr.bf16.mxu0 %v3395_v46  ;;  %2821 = vmatprep.subr.bf16.mxu1 %v4199_v27 }
 0x3e1   :  { %1322 = vmatpush1.bf16.msra.mxu0 %v3409_v48  ;;  %2822 = vmatpush3.bf16.msra.mxu1 %v3428_v50 }
 0x3e2   :  { %1323 = vmatprep.subr.bf16.mxu0 %v3443_v51  ;;  %2823 = vmatprep.subr.bf16.mxu1 %v4199_v27 }
 0x3e5   :  { %1324 = vmatpush1.bf16.msra.mxu0 %v3448_v52  ;;  %2824 = vmatpush3.bf16.msra.mxu1 %v3453_v53 }
 0x3e6   :  { %1429 = vmatprep.subr.bf16.mxu0 %v3782_v22  ;;  %2829 = vmatprep.subr.bf16.mxu1 %v4199_v27 }
 0x488   :  { %v1223_v23 = vpop.f32.mrf.mxu0  ;;  %v1264_v29 = vpop.f32.mrf.mxu1 }
 0x489   :  { %v1224_v30 = vadd.f32 %v1223_v23, %v3607_v7  ;;  %v1265_v20 = vadd.f32 %v1264_v29, %v3619_v63 }
 0x48a   :  { %v1225_v32 = vpop.f32.mrf.mxu0  ;;  %v2807_v33 = vpop.f32.mrf.mxu1 }
 0x48b   :  { %v1270_v34 = vadd.f32 %v1224_v30, %v3569_v24  ;;  %v1226_v40 = vadd.f32 %v1225_v32, %v3611_v8 }
 0x48c   :  { %v1227_v35 = vpop.f32.mrf.mxu0  ;;  %v1267_v37 = vpop.f32.mrf.mxu1 }
 0x48d   :  { %v2453_v39 = vmul.f32 -1.442695, %v1270_v34  ;;  %v1277_v45 = vadd.f32 %v1226_v40, %v3574_v44  ;;  %v1863_v44 = vunpack.c.l.s4 %v3108_v6  ;;  %v3858_v40 = vld [vmem:[%s4174_s6 + $0x7c] ss:$12 sps:$4 sm:$0xff]  }
 0x48e   :  { %v1228_v41 = vpop.f32.mrf.mxu0  ;;  %v2808_v42 = vpop.f32.mrf.mxu1 }
 0x48f   :  { %3030 = vpow2.f32 %v2453_v39  ;;  %v2454_v46 = vmul.f32 -1.442695, %v1277_v45  ;;  %v1864_v4 = vunpack.c.0.s8 %v1863_v44  ;;  %v3865_v41 = vld [vmem:[%s4174_s6 + $0x78] ss:$12 sps:$4 sm:$0xff]   ;;  %v3871_v42 = vld [vmem:[%s4174_s6 + $0x80] ss:$12 sps:$4 sm:$0xff]  }
 0x490   :  { %v3877_v45 = vld [vmem:[%s4174_s6 + $0x64] ss:$12 sps:$4 sm:$0xff]  }
 0x491   :  { %3032 = vpow2.f32 %v2454_v46  ;;  %v3801_v17 = vsub.s32 %v1864_v4, %v3485_v2  ;;  %v3820_v2 = vld [vmem:[%s4174_s6 + $0x94] ss:$12 sps:$4 sm:$0xff]  }
 0x492   :  { %v3884_v46 = vld [vmem:[%s4174_s6 + $0x60] ss:$12 sps:$4 sm:$0xff]  }
 0x49c   :  { %v3031_v21 = vpop.eup %3030 }
 0x49d   :  { %v1274_v19 = vadd.f32 1.0, %v3031_v21  ;;  %v3891_v21 = vld [vmem:[%s4174_s6 + $0x4c] ss:$12 sps:$4 sm:$0xff]  }
 0x49e   :  { %v3033_v15 = vpop.eup %3032 }
 0x49f   :  { %3034 = vrcp.f32 %v1274_v19  ;;  %v1281_v10 = vadd.f32 1.0, %v3033_v15  ;;  %v3898_v19 = vld [vmem:[%s4174_s6 + $0x48] ss:$12 sps:$4 sm:$0xff]   ;;  %v3912_v15 = vld [vmem:[%s4174_s6 + $0x30] ss:$12 sps:$4 sm:$0xff]  }
 0x4a1   :  { %3036 = vrcp.f32 %v1281_v10 }
 0x4ac   :  { %v3035_v24 = vpop.eup %3034 }
 0x4ad   :  { %v1284_v13 = vmul.f32 %v3035_v24, %v1265_v20 }
 0x4ae   :  { %v3037_v38 = vpop.eup %3036 }
 0x4af   :  { %v1285_v11 = vadd.f32 %v1284_v13, %v3524_v28  ;;  %v1287_v31 = vsub.f32 1.0, %v3037_v38  ;;  %v1289_v16 = vmul.f32 %v3037_v38, %v3734_v57 }
 0x4b1   :  { %3038 = vtanh.f32 %v1285_v11 }
 0x4be   :  { %v3039_v54 = vpop.eup %3038 }
 0x4bf   :  { %v1288_v61 = vmul.f32 %v3039_v54, %v1287_v31 }
 0x4c1   :  { %v1290_v0 = vadd.f32 %v1289_v16, %v1288_v61 }
 0x4c3   :  { %v1297_v55 = vsel %vm1296_vm14, %v1290_v0, 0.0  ;;  %v3794_v1 = vsel %vm1296_vm14, %v1290_v0, %v3734_v57  ;;  %v3808_v57 = vld [vmem:[%s4174_s6 + $0xa8] ss:$12 sps:$4 sm:$0xff]  }
 0x4c4   :  { %v1308_v28 = vpack.c.bf16 %v3794_v1, %v3794_v1  ;;  %v1812_v25 = vcombine.low %v3681_v36, %v1297_v55  ;;  %v1813_v26 = vcombine.high %v3681_v36, %v1297_v55  ;;  %v3814_v36 = vld [vmem:[%s4174_s6 + $0xb0] ss:$12 sps:$4 sm:$0xff]  }
 0x4c6   :  { %1342 = vmatmul.mubr.bf16.vlgmr.msra.gmra.mxu0 %v1308_v28  ;;  %2826 = vmatmul.mubr.bf16.vlgmr.msra.gmra.mxu1 %v1308_v28  ;;  %v1820_v60 = vrot.slane %v1812_v25, %v3731_v58  ;;  %v1827_v23 = vrot.slane %v1813_v26, %v3731_v58 }
 0x4c7   :  { %1430 = vmatpush1.bf16.msra.mxu0 %v3808_v57  ;;  %2830 = vmatpush3.bf16.msra.mxu1 %v3814_v36 }
 0x4c8   :  { %1431 = vmatprep.subr.bf16.mxu0 %v3820_v2  ;;  %2831 = vmatprep.subr.bf16.mxu1 %v4199_v27  ;;  %v1860_v29 = vcombine.low %v3741_v59, %v1820_v60  ;;  %v1861_v30 = vcombine.high %v3741_v59, %v1820_v60  ;;  %v1876_v32 = vcombine.low %v3744_v12, %v1827_v23  ;;  %v3843_v59 = vld [vmem:[%s4174_s6 + $0x90] ss:$12 sps:$4 sm:$0xff]   ;;  %v1415_v60 = vpop.permute.xlu0 %1414 }
 0x4c9   :  { %1461 = vmatprep.mubr.bf16.mxu0 %v4200_v3  ;;  %2845 = vmatprep.mubr.msk.bf16.mxu1 %vm3105_vm0, %v4199_v27  ;;  %v1877_v33 = vcombine.high %v3744_v12, %v1827_v23  ;;  %v3849_v12 = vld [vmem:[%s4174_s6 + $0x98] ss:$12 sps:$4 sm:$0xff]   ;;  %vm1416_vm15 = vcmp.eq.s32.totalorder %v1415_v60, 1 }
 0x4ca   :  { %v3832_v34 = vrot.slane %v1860_v29, %v3801_v17  ;;  %v3835_v35 = vrot.slane %v1861_v30, %v3801_v17  ;;  %v3838_v37 = vrot.slane %v1876_v32, %v3801_v17 }
 0x4cb   :  { %1432 = vmatpush1.bf16.msra.mxu0 %v3843_v59  ;;  %2832 = vmatpush3.bf16.msra.mxu1 %v3849_v12  ;;  %v3853_v39 = vrot.slane %v1877_v33, %v3801_v17  ;;  %v3982_v33 = vld [vmem:[%s4174_s6 + $0x38] ss:$12 sps:$4 sm:$0xff]  }
 0x4cc   :  { %1433 = vmatprep.subr.bf16.mxu0 %v3858_v40  ;;  %2833 = vmatprep.subr.bf16.mxu1 %v4199_v27 }
 0x4cf   :  { %1434 = vmatpush1.bf16.msra.mxu0 %v3865_v41  ;;  %2834 = vmatpush3.bf16.msra.mxu1 %v3871_v42 }
 0x4d0   :  { %1435 = vmatprep.subr.bf16.mxu0 %v3877_v45  ;;  %2835 = vmatprep.subr.bf16.mxu1 %v4199_v27 }
 0x4d3   :  { %1436 = vmatpush1.bf16.msra.mxu0 %v3884_v46  ;;  %2836 = vmatpush3.bf16.msra.mxu1 %v3379_v43  ;;  %v3905_v43 = vld [vmem:[%s4174_s6 + $0x34] ss:$12 sps:$4 sm:$0xff]  }
 0x4d4   :  { %1437 = vmatprep.subr.bf16.mxu0 %v3891_v21  ;;  %2837 = vmatprep.subr.bf16.mxu1 %v4199_v27 }
 0x4d7   :  { %1438 = vmatpush1.bf16.msra.mxu0 %v3898_v19  ;;  %2838 = vmatpush3.bf16.msra.mxu1 %v3401_v47  ;;  %v3919_v47 = vld [vmem:[%s4174_s6 + $0x1c] ss:$12 sps:$4 sm:$0xff]  }
 0x4d8   :  { %1439 = vmatprep.subr.bf16.mxu0 %v3905_v43  ;;  %2839 = vmatprep.subr.bf16.mxu1 %v4199_v27 }
 0x4db   :  { %1440 = vmatpush1.bf16.msra.mxu0 %v3912_v15  ;;  %2840 = vmatpush3.bf16.msra.mxu1 %v3420_v49 }
 0x4dc   :  { %1441 = vmatprep.subr.bf16.mxu0 %v3919_v47  ;;  %2841 = vmatprep.subr.bf16.mxu1 %v4199_v27 }
 0x4df   :  { %1442 = vmatpush1.bf16.msra.mxu0 %v3409_v48  ;;  %2842 = vmatpush3.bf16.msra.mxu1 %v3428_v50 }
 0x4e0   :  { %1443 = vmatprep.subr.bf16.mxu0 %v3443_v51  ;;  %2843 = vmatprep.subr.bf16.mxu1 %v4199_v27 }
 0x4e3   :  { %1444 = vmatpush1.bf16.msra.mxu0 %v3448_v52  ;;  %2844 = vmatpush3.bf16.msra.mxu1 %v3453_v53 }
 0x4e4   :  { %1549 = vmatprep.subr.bf16.mxu0 %v3782_v22  ;;  %2849 = vmatprep.subr.bf16.mxu1 %v4199_v27 }
 0x586   :  { %v1343_v49 = vpop.f32.mrf.mxu0  ;;  %v1384_v10 = vpop.f32.mrf.mxu1 }
 0x587   :  { %v1344_v20 = vadd.f32 %v1343_v49, %v3607_v7  ;;  %v1385_v5 = vadd.f32 %v1384_v10, %v3619_v63  ;;  %v3990_v49 = vld [vmem:[%s4174_s6 + $0x18] ss:$12 sps:$4 sm:$0xff]   ;;  %v3996_v10 = vld [vmem:[%s4174_s6 + $0x20] ss:$12 sps:$4 sm:$0xff]  }
 0x588   :  { %v1345_v24 = vpop.f32.mrf.mxu0  ;;  %v2827_v48 = vpop.f32.mrf.mxu1 }
 0x589   :  { %v1390_v50 = vadd.f32 %v1344_v20, %v3579_v62  ;;  %v1346_v38 = vadd.f32 %v1345_v24, %v3611_v8  ;;  %v4002_v20 = vld [vmem:[%s4174_s6 + $0x4] ss:$12 sps:$4 sm:$0xff]   ;;  %v4009_v24 = vld [vmem:[%s4174_s6] ss:$12 sps:$4 sm:$0xff]   ;;  %v4015_v48 = vld [vmem:[%s4174_s6 + $0x8] ss:$12 sps:$4 sm:$0xff]  }
 0x58a   :  { %v1347_v13 = vpop.f32.mrf.mxu0  ;;  %v1387_v51 = vpop.f32.mrf.mxu1 }
 0x58b   :  { %v2455_v11 = vmul.f32 -1.442695, %v1390_v50  ;;  %v1397_v53 = vadd.f32 %v1346_v38, %v3582_v9 }
 0x58c   :  { %v1348_v52 = vpop.f32.mrf.mxu0  ;;  %v2828_v31 = vpop.f32.mrf.mxu1 }
 0x58d   :  { %3040 = vpow2.f32 %v2455_v11  ;;  %v2456_v54 = vmul.f32 -1.442695, %v1397_v53 }
 0x58f   :  { %3042 = vpow2.f32 %v2456_v54 }
 0x59a   :  { %v3041_v6 = vpop.eup %3040 }
 0x59b   :  { %v1394_v44 = vadd.f32 1.0, %v3041_v6 }
 0x59c   :  { %v3043_v61 = vpop.eup %3042 }
 0x59d   :  { %3044 = vrcp.f32 %v1394_v44  ;;  %v1401_v16 = vadd.f32 1.0, %v3043_v61 }
 0x59f   :  { %3046 = vrcp.f32 %v1401_v16 }
 0x5aa   :  { %v3045_v62 = vpop.eup %3044 }
 0x5ab   :  { %v1404_v0 = vmul.f32 %v3045_v62, %v1385_v5 }
 0x5ac   :  { %v3047_v55 = vpop.eup %3046 }
 0x5ad   :  { %v1405_v4 = vadd.f32 %v1404_v0, %v3535_v56  ;;  %v1407_v28 = vsub.f32 1.0, %v3047_v55  ;;  %v1409_v9 = vmul.f32 %v3047_v55, %v3794_v1  ;;  %v3964_v56 = vld [vmem:[%s4174_s6 + $0x68] ss:$12 sps:$4 sm:$0xff]  }
 0x5af   :  { %3048 = vtanh.f32 %v1405_v4 }
 0x5bc   :  { %v3049_v25 = vpop.eup %3048 }
 0x5bd   :  { %v1408_v26 = vmul.f32 %v3049_v25, %v1407_v28  ;;  %v4201_v25 = vld [vmem:[#allocation7_spill] sm:$0xff] }
 0x5bf   :  { %v1410_v23 = vadd.f32 %v1409_v9, %v1408_v26 }
 0x5c1   :  { %v3938_v29 = vsel %vm1416_vm15, %v1410_v23, 0.0  ;;  %v3941_v30 = vsel %vm1416_vm15, %v1410_v23, %v3794_v1  ;;  %v3973_v1 = vld [vmem:[%s4174_s6 + $0x50] ss:$12 sps:$4 sm:$0xff]  }
 0x5c2   :  { %v1428_v32 = vpack.c.bf16 %v3941_v30, %v3941_v30 }
 0x5c4   :  { %1462 = vmatmul.mubr.bf16.vlgmr.msra.gmra.mxu0 %v1428_v32  ;;  %2846 = vmatmul.mubr.bf16.vlgmr.msra.gmra.mxu1 %v1428_v32 }
 0x5c5   :  { %1550 = vmatpush1.bf16.msra.mxu0 %v3808_v57  ;;  %2850 = vmatpush3.bf16.msra.mxu1 %v3814_v36 }
 0x5c6   :  { %1551 = vmatprep.subr.bf16.mxu0 %v3820_v2  ;;  %2851 = vmatprep.subr.bf16.mxu1 %v4199_v27 }
 0x5c7   :  { %1581 = vmatprep.mubr.bf16.mxu0 %v4200_v3  ;;  %2865 = vmatprep.mubr.msk.bf16.mxu1 %vm3105_vm0, %v4199_v27 }
 0x5c9   :  { %1552 = vmatpush1.bf16.msra.mxu0 %v3843_v59  ;;  %2852 = vmatpush3.bf16.msra.mxu1 %v3849_v12 }
 0x5ca   :  { %1553 = vmatprep.subr.bf16.mxu0 %v3858_v40  ;;  %2853 = vmatprep.subr.bf16.mxu1 %v4199_v27 }
 0x5cd   :  { %1554 = vmatpush1.bf16.msra.mxu0 %v3865_v41  ;;  %2854 = vmatpush3.bf16.msra.mxu1 %v3871_v42 }
 0x5ce   :  { %1555 = vmatprep.subr.bf16.mxu0 %v3877_v45  ;;  %2855 = vmatprep.subr.bf16.mxu1 %v4199_v27 }
 0x5d1   :  { %1556 = vmatpush1.bf16.msra.mxu0 %v3884_v46  ;;  %2856 = vmatpush3.bf16.msra.mxu1 %v3964_v56 }
 0x5d2   :  { %1557 = vmatprep.subr.bf16.mxu0 %v3891_v21  ;;  %2857 = vmatprep.subr.bf16.mxu1 %v4199_v27 }
 0x5d5   :  { %1558 = vmatpush1.bf16.msra.mxu0 %v3898_v19  ;;  %2858 = vmatpush3.bf16.msra.mxu1 %v3973_v1 }
 0x5d6   :  { %1559 = vmatprep.subr.bf16.mxu0 %v3905_v43  ;;  %2859 = vmatprep.subr.bf16.mxu1 %v4199_v27 }
 0x5d9   :  { %1560 = vmatpush1.bf16.msra.mxu0 %v3912_v15  ;;  %2860 = vmatpush3.bf16.msra.mxu1 %v3982_v33 }
 0x5da   :  { %1561 = vmatprep.subr.bf16.mxu0 %v3919_v47  ;;  %2861 = vmatprep.subr.bf16.mxu1 %v4199_v27 }
 0x5dd   :  { %1562 = vmatpush1.bf16.msra.mxu0 %v3990_v49  ;;  %2862 = vmatpush3.bf16.msra.mxu1 %v3996_v10 }
 0x5de   :  { %1563 = vmatprep.subr.bf16.mxu0 %v4002_v20  ;;  %2863 = vmatprep.subr.bf16.mxu1 %v4199_v27 }
 0x5e1   :  { %1564 = vmatpush1.bf16.msra.mxu0 %v4009_v24  ;;  %2864 = vmatpush3.bf16.msra.mxu1 %v4015_v48 }
 0x5e2   :  { %1669 = vmatprep.subr.bf16.mxu0 %v3782_v22  ;;  %2869 = vmatprep.subr.bf16.mxu1 %v4199_v27 }
 0x684   :  { %v1463_v50 = vpop.f32.mrf.mxu0  ;;  %v1504_v13 = vpop.f32.mrf.mxu1 }
 0x685   :  { %v1464_v51 = vadd.f32 %v1463_v50, %v3607_v7  ;;  %v1505_v55 = vadd.f32 %v1504_v13, %v3619_v63  ;;  %v1535_v50 = vpop.permute.xlu1 %1534 }
 0x686   :  { %v1465_v11 = vpop.f32.mrf.mxu0  ;;  %v2847_v38 = vpop.f32.mrf.mxu1  ;;  %vm1536_vm1 = vcmp.eq.s32.totalorder %v1535_v50, 1 }
 0x687   :  { %v1510_v52 = vadd.f32 %v1464_v51, %v3585_v14  ;;  %v1466_v6 = vadd.f32 %v1465_v11, %v3611_v8 }
 0x688   :  { %v1467_v31 = vpop.f32.mrf.mxu0  ;;  %v1507_v53 = vpop.f32.mrf.mxu1 }
 0x689   :  { %v2457_v54 = vmul.f32 -1.442695, %v1510_v52  ;;  %v1517_v22 = vadd.f32 %v1466_v6, %v3588_v18  ;;  %v1655_v53 = vpop.permute.xlu0 %1654 }
 0x68a   :  { %v1468_v44 = vpop.f32.mrf.mxu0  ;;  %v2848_v61 = vpop.f32.mrf.mxu1 }
 0x68b   :  { %3050 = vpow2.f32 %v2457_v54  ;;  %v2458_v16 = vmul.f32 -1.442695, %v1517_v22 }
 0x68d   :  { %3052 = vpow2.f32 %v2458_v16 }
 0x698   :  { %v3051_v5 = vpop.eup %3050 }
 0x699   :  { %v1514_v62 = vadd.f32 1.0, %v3051_v5 }
 0x69a   :  { %v3053_v0 = vpop.eup %3052 }
 0x69b   :  { %3054 = vrcp.f32 %v1514_v62  ;;  %v1521_v4 = vadd.f32 1.0, %v3053_v0 }
 0x69d   :  { %3056 = vrcp.f32 %v1521_v4 }
 0x6a8   :  { %v3055_v14 = vpop.eup %3054 }
 0x6a9   :  { %v1524_v28 = vmul.f32 %v3055_v14, %v1505_v55  ;;  %v2972_v55 = vld [vmem:[%s4179_s10 + $0x38] sm:$0xff]   ;;  %v2973_v14 = vld [vmem:[%s4179_s10 + $0x30] sm:$0xff]  }
 0x6aa   :  { %v3057_v9 = vpop.eup %3056 }
 0x6ab   :  { %v1525_v26 = vadd.f32 %v1524_v28, %v4201_v25  ;;  %v1527_v60 = vsub.f32 1.0, %v3057_v9  ;;  %v1529_v18 = vmul.f32 %v3057_v9, %v3941_v30  ;;  %v2975_v28 = vld [vmem:[%s4179_s10 + $0x20] sm:$0xff]   ;;  %v2976_v25 = vld [vmem:[%s4179_s10 + $0x18] sm:$0xff]   ;;  %v2978_v9 = vld [vmem:[%s4179_s10 + $0x8] sm:$0xff]  }
 0x6ad   :  { %3058 = vtanh.f32 %v1525_v26  ;;  %v2977_v26 = vld [vmem:[%s4179_s10 + $0x10] sm:$0xff]  }
 0x6ba   :  { %v3059_v23 = vpop.eup %3058 }
 0x6bb   :  { %v1528_v32 = vmul.f32 %v3059_v23, %v1527_v60  ;;  %v2979_v60 = vld [vmem:[%s4179_s10] sm:$0xff]  }
 0x6bd   :  { %v1530_v51 = vadd.f32 %v1529_v18, %v1528_v32 }
 0x6bf   :  { %v4027_v11 = vsel %vm1536_vm1, %v1530_v51, 0.0  ;;  %v4030_v38 = vsel %vm1536_vm1, %v1530_v51, %v3941_v30 }
 0x6c0   :  { %v1548_v13 = vpack.c.bf16 %v4030_v38, %v4030_v38 }
 0x6c2   :  { %1582 = vmatmul.mubr.bf16.vlgmr.msra.gmra.mxu0 %v1548_v13  ;;  %2866 = vmatmul.mubr.bf16.vlgmr.msra.gmra.mxu1 %v1548_v13 }
 0x6c3   :  { %1670 = vmatpush1.bf16.msra.mxu0 %v3808_v57  ;;  %2870 = vmatpush3.bf16.msra.mxu1 %v3814_v36 }
 0x6c4   :  { %1671 = vmatprep.subr.bf16.mxu0 %v3820_v2  ;;  %2871 = vmatprep.subr.bf16.mxu1 %v4199_v27 }
 0x6c5   :  { %1701 = vmatprep.mubr.bf16.mxu0 %v4200_v3  ;;  %2885 = vmatprep.mubr.msk.bf16.mxu1 %vm3105_vm0, %v4199_v27  ;;  %vm1656_vm0 = vcmp.eq.s32.totalorder %v1655_v53, 1 }
 0x6c7   :  { %1672 = vmatpush1.bf16.msra.mxu0 %v3843_v59  ;;  %2872 = vmatpush3.bf16.msra.mxu1 %v3849_v12  ;;  %v4202_v12 = vld [vmem:[#allocation8_spill] sm:$0xff] }
 0x6c8   :  { %1673 = vmatprep.subr.bf16.mxu0 %v3858_v40  ;;  %2873 = vmatprep.subr.bf16.mxu1 %v4199_v27 }
 0x6cb   :  { %1674 = vmatpush1.bf16.msra.mxu0 %v3865_v41  ;;  %2874 = vmatpush3.bf16.msra.mxu1 %v3871_v42 }
 0x6cc   :  { %1675 = vmatprep.subr.bf16.mxu0 %v3877_v45  ;;  %2875 = vmatprep.subr.bf16.mxu1 %v4199_v27 }
 0x6cf   :  { %1676 = vmatpush1.bf16.msra.mxu0 %v3884_v46  ;;  %2876 = vmatpush3.bf16.msra.mxu1 %v3964_v56 }
 0x6d0   :  { %1677 = vmatprep.subr.bf16.mxu0 %v3891_v21  ;;  %2877 = vmatprep.subr.bf16.mxu1 %v4199_v27 }
 0x6d3   :  { %1678 = vmatpush1.bf16.msra.mxu0 %v3898_v19  ;;  %2878 = vmatpush3.bf16.msra.mxu1 %v3973_v1 }
 0x6d4   :  { %1679 = vmatprep.subr.bf16.mxu0 %v3905_v43  ;;  %2879 = vmatprep.subr.bf16.mxu1 %v4199_v27 }
 0x6d7   :  { %1680 = vmatpush1.bf16.msra.mxu0 %v3912_v15  ;;  %2880 = vmatpush3.bf16.msra.mxu1 %v3982_v33 }
 0x6d8   :  { %1681 = vmatprep.subr.bf16.mxu0 %v3919_v47  ;;  %2881 = vmatprep.subr.bf16.mxu1 %v4199_v27 }
 0x6db   :  { %1682 = vmatpush1.bf16.msra.mxu0 %v3990_v49  ;;  %2882 = vmatpush3.bf16.msra.mxu1 %v3996_v10 }
 0x6dc   :  { %1683 = vmatprep.subr.bf16.mxu0 %v4002_v20  ;;  %2883 = vmatprep.subr.bf16.mxu1 %v4199_v27  ;;  %v4203_v27 = vld [vmem:[#allocation9_spill] sm:$0xff] }
 0x6dd   :  { %v4204_v20 = vld [vmem:[#allocation5_spill] sm:$0xff] }
 0x6df   :  { %1684 = vmatpush1.bf16.msra.mxu0 %v4009_v24  ;;  %2884 = vmatpush3.bf16.msra.mxu1 %v4015_v48 }
 0x6e0   :  { %2889 = vmatprep.subr.bf16.mxu0 %v2972_v55 }
 0x782   :  { %v1583_v3 = vpop.f32.mrf.mxu0  ;;  %v1624_v57 = vpop.f32.mrf.mxu1 }
 0x783   :  { %v1584_v36 = vadd.f32 %v1583_v3, %v3607_v7  ;;  %v1625_v33 = vadd.f32 %v1624_v57, %v3619_v63 }
 0x784   :  { %v1585_v2 = vpop.f32.mrf.mxu0  ;;  %v2867_v59 = vpop.f32.mrf.mxu1 }
 0x785   :  { %v1630_v40 = vadd.f32 %v1584_v36, %v4202_v12  ;;  %v1586_v46 = vadd.f32 %v1585_v2, %v3611_v8 }
 0x786   :  { %v1587_v41 = vpop.f32.mrf.mxu0  ;;  %v1627_v42 = vpop.f32.mrf.mxu1 }
 0x787   :  { %v2459_v45 = vmul.f32 -1.442695, %v1630_v40  ;;  %v1637_v43 = vadd.f32 %v1586_v46, %v4203_v27  ;;  %v4206_v40 = vld [vmem:[#allocation11_spill] sm:$0xff] }
 0x788   :  { %v1588_v21 = vpop.f32.mrf.mxu0  ;;  %v2868_v19 = vpop.f32.mrf.mxu1 }
 0x789   :  { %3060 = vpow2.f32 %v2459_v45  ;;  %v2460_v15 = vmul.f32 -1.442695, %v1637_v43 }
 0x78b   :  { %3062 = vpow2.f32 %v2460_v15  ;;  %v4207_v15 = vld [vmem:[#allocation6_spill] sm:$0xff] }
 0x796   :  { %v3061_v47 = vpop.eup %3060 }
 0x797   :  { %v1634_v30 = vadd.f32 1.0, %v3061_v47 }
 0x798   :  { %v3063_v56 = vpop.eup %3062 }
 0x799   :  { %3064 = vrcp.f32 %v1634_v30  ;;  %v1641_v1 = vadd.f32 1.0, %v3063_v56  ;;  %v2982_v30 = vld [vmem:[#allocation4 + $0x20] ss:$24 sps:$4 sm:$0xff]  }
 0x79a   :  { %v2984_v56 = vld [vmem:[#allocation4 + $0x60] ss:$24 sps:$4 sm:$0xff]  }
 0x79b   :  { %3066 = vrcp.f32 %v1641_v1  ;;  %v2986_v1 = vld [vmem:[#allocation4 + $0x70] ss:$-72 sps:$4 sm:$0xff]  }
 0x79c   :  { %v1988_v53 = vrot.slane %v2986_v1, %v3731_v58 }
 0x7a6   :  { %v3065_v49 = vpop.eup %3064 }
 0x7a7   :  { %v1644_v10 = vmul.f32 %v3065_v49, %v1625_v33  ;;  %v2992_v49 = vld [vmem:[#allocation4 + $0x44] ss:$-48 sps:$4 sm:$0xff]  }
 0x7a8   :  { %v3067_v48 = vpop.eup %3066 }
 0x7a9   :  { %v1645_v24 = vadd.f32 %v1644_v10, %v4204_v20  ;;  %v1647_v52 = vsub.f32 1.0, %v3067_v48  ;;  %v1649_v6 = vmul.f32 %v3067_v48, %v4030_v38  ;;  %v2993_v10 = vld [vmem:[#allocation4 + $0x24] ss:$24 sps:$4 sm:$0xff]  }
 0x7aa   :  { %v2994_v20 = vld [vmem:[#allocation4 + $0x64] ss:$24 sps:$4 sm:$0xff]  }
 0x7ab   :  { %3068 = vtanh.f32 %v1645_v24  ;;  %v2995_v24 = vld [vmem:[#allocation4 + $0x74] ss:$-72 sps:$4 sm:$0xff]  }
 0x7b8   :  { %v3069_v31 = vpop.eup %3068 }
 0x7b9   :  { %v1648_v54 = vmul.f32 %v3069_v31, %v1647_v52  ;;  %v1956_v52 = vrot.slane %v2982_v30, %v3731_v58  ;;  %v1972_v31 = vrot.slane %v2984_v56, %v3731_v58 }
 0x7bb   :  { %v1650_v44 = vadd.f32 %v1649_v6, %v1648_v54  ;;  %v1947_v6 = vrot.slane %v2992_v49, %v3731_v58 }
 0x7bd   :  { %v1657_v61 = vsel %vm1656_vm0, %v1650_v44, 0.0  ;;  %v4075_v22 = vsel %vm1656_vm0, %v1650_v44, %v4030_v38  ;;  %v4205_v38 = vld [vmem:[#allocation10_spill] sm:$0xff]  ;;  %v1963_v44 = vrot.slane %v2993_v10, %v3731_v58 }
 0x7be   :  { %v1668_v16 = vpack.c.bf16 %v4075_v22, %v4075_v22  ;;  %v1828_v5 = vcombine.low %v3938_v29, %v1657_v61  ;;  %v1829_v62 = vcombine.high %v3938_v29, %v1657_v61  ;;  %v2974_v29 = vld [vmem:[%s4179_s10 + $0x28] sm:$0xff]   ;;  %v1775_v61 = vpop.permute.xlu1 %1774 }
 0x7bf   :  { %vm1776_vm2 = vcmp.eq.s32.totalorder %v1775_v61, 1 }
 0x7c0   :  { %1702 = vmatmul.mubr.bf16.vlgmr.msra.gmra.mxu0 %v1668_v16  ;;  %2886 = vmatmul.mubr.bf16.vlgmr.msra.gmra.mxu1 %v1668_v16  ;;  %v4082_v0 = vrot.slane %v1828_v5, %v3731_v58  ;;  %v4085_v4 = vrot.slane %v1829_v62, %v3731_v58  ;;  %v1979_v62 = vrot.slane %v2994_v20, %v3731_v58 }
 0x7c1   :  { %2890 = vmatpush3.bf16.msra.mxu0 %v2972_v55  ;;  %v1995_v55 = vrot.slane %v2995_v24, %v3731_v58 }
 0x7c2   :  { %2891 = vmatprep.subr.bf16.mxu0 %v2973_v14 }
 0x7c5   :  { %2892 = vmatpush3.bf16.msra.mxu0 %v2973_v14 }
 0x7c6   :  { %2893 = vmatprep.subr.bf16.mxu0 %v2974_v29 }
 0x7c9   :  { %2894 = vmatpush3.bf16.msra.mxu0 %v2974_v29 }
 0x7ca   :  { %2895 = vmatprep.subr.bf16.mxu0 %v2975_v28 }
 0x7cd   :  { %2896 = vmatpush3.bf16.msra.mxu0 %v2975_v28  ;;  %v2028_v28 = vcombine.low %v1972_v31, %v1988_v53 }
 0x7ce   :  { %2897 = vmatprep.subr.bf16.mxu0 %v2976_v25 }
 0x7d1   :  { %2898 = vmatpush3.bf16.msra.mxu0 %v2976_v25 }
 0x7d2   :  { %2899 = vmatprep.subr.bf16.mxu0 %v2977_v26 }
 0x7d5   :  { %2900 = vmatpush3.bf16.msra.mxu0 %v2977_v26  ;;  %v2029_v26 = vcombine.high %v1972_v31, %v1988_v53 }
 0x7d6   :  { %2901 = vmatprep.subr.bf16.mxu0 %v2978_v9 }
 0x7d9   :  { %2902 = vmatpush3.bf16.msra.mxu0 %v2978_v9  ;;  %v2012_v9 = vcombine.low %v1947_v6, %v1963_v44 }
 0x7da   :  { %2903 = vmatprep.subr.bf16.mxu0 %v2979_v60 }
 0x7dd   :  { %2904 = vmatpush3.bf16.msra.mxu0 %v2979_v60 }
 0x880   :  { %v1703_v23 = vpop.f32.mrf.mxu0  ;;  %v1744_v32 = vpop.f32.mrf.mxu1 }
 0x881   :  { %v1704_v18 = vadd.f32 %v1703_v23, %v3607_v7  ;;  %v1745_v19 = vadd.f32 %v1744_v32, %v3619_v63  ;;  %v2044_v23 = vcombine.low %v1979_v62, %v1995_v55  ;;  %v2013_v32 = vcombine.high %v1947_v6, %v1963_v44 }
 0x882   :  { %v1705_v50 = vpop.f32.mrf.mxu0  ;;  %v2887_v51 = vpop.f32.mrf.mxu1 }
 0x883   :  { %v1750_v13 = vadd.f32 %v1704_v18, %v4205_v38  ;;  %v1706_v2 = vadd.f32 %v1705_v50, %v3611_v8  ;;  %v2980_v8 = vld [vmem:[#allocation4 + $0x40] ss:$-48 sps:$4 sm:$0xff]   ;;  %v2045_v18 = vcombine.high %v1979_v62, %v1995_v55  ;;  %v2036_v38 = vrot.slane %v2028_v28, %v3801_v17 }
 0x884   :  { %v1707_v3 = vpop.f32.mrf.mxu0  ;;  %v1747_v57 = vpop.f32.mrf.mxu1  ;;  %v1940_v48 = vrot.slane %v2980_v8, %v3731_v58  ;;  %v2479_v55 = vld [vmem:[%s4180_s11] ss:$0 sm:$0xff] }
 0x885   :  { %v2461_v36 = vmul.f32 -1.442695, %v1750_v13  ;;  %v1757_v41 = vadd.f32 %v1706_v2, %v4206_v40  ;;  %v2043_v3 = vrot.slane %v2029_v26, %v3801_v17  ;;  %v2020_v2 = vrot.slane %v2012_v9, %v3801_v17 }
 0x886   :  { %v1708_v59 = vpop.f32.mrf.mxu0  ;;  %v2888_v12 = vpop.f32.mrf.mxu1  ;;  %v1996_v14 = vcombine.low %v1940_v48, %v1956_v52  ;;  %v1997_v25 = vcombine.high %v1940_v48, %v1956_v52 }
 0x887   :  { %3070 = vpow2.f32 %v2461_v36  ;;  %v2462_v42 = vmul.f32 -1.442695, %v1757_v41  ;;  %v2052_v59 = vrot.slane %v2044_v23, %v3801_v17  ;;  %v2027_v12 = vrot.slane %v2013_v32, %v3801_v17 }
 0x888   :  { %v2011_v13 = vrot.slane %v1997_v25, %v3801_v17 }
 0x889   :  { %3072 = vpow2.f32 %v2462_v42  ;;  %v2065_v8 = vcombine.high %v2020_v2, %v2052_v59 }
 0x894   :  { %v3071_v45 = vpop.eup %3070 }
 0x895   :  { %v1754_v46 = vadd.f32 1.0, %v3071_v45 }
 0x896   :  { %v3073_v7 = vpop.eup %3072 }
 0x897   :  { %3074 = vrcp.f32 %v1754_v46  ;;  %v1761_v21 = vadd.f32 1.0, %v3073_v7 }
 0x899   :  { %3076 = vrcp.f32 %v1761_v21  ;;  %v2062_v21 = vcombine.low %v2011_v13, %v2043_v3 }
 0x8a4   :  { %v3075_v27 = vpop.eup %3074 }
 0x8a5   :  { %v1764_v43 = vmul.f32 %v3075_v27, %v1745_v19 }
 0x8a6   :  { %v3077_v33 = vpop.eup %3076 }
 0x8a7   :  { %v1765_v47 = vadd.f32 %v1764_v43, %v4207_v15  ;;  %v1767_v63 = vsub.f32 1.0, %v3077_v33  ;;  %v1769_v5 = vmul.f32 %v3077_v33, %v4075_v22  ;;  %v2004_v22 = vrot.slane %v1996_v14, %v3801_v17 }
 0x8a9   :  { %3078 = vtanh.f32 %v1765_v47  ;;  %v2060_v46 = vcombine.low %v2004_v22, %v2036_v38  ;;  %v2061_v7 = vcombine.high %v2004_v22, %v2036_v38  ;;  %v2064_v47 = vcombine.low %v2020_v2, %v2052_v59 }
 0x8b6   :  { %v3079_v54 = vpop.eup %3078 }
 0x8b7   :  { %v1768_v16 = vmul.f32 %v3079_v54, %v1767_v63 }
 0x8b9   :  { %v1770_v29 = vadd.f32 %v1769_v5, %v1768_v16 }
 0x8bb   :  { %v1777_v60 = vsel %vm1776_vm2, %v1770_v29, 0.0 }
 0x8bc   :  { %v1844_v50 = vcombine.low %v4027_v11, %v1777_v60  ;;  %v1845_v51 = vcombine.high %v4027_v11, %v1777_v60  ;;  %v2059_v11 = vrot.slane %v2045_v18, %v3801_v17 }
 0x8be   :  { %v1852_v57 = vrot.slane %v1844_v50, %v3731_v58  ;;  %v1859_v36 = vrot.slane %v1845_v51, %v3731_v58  ;;  %v2063_v58 = vcombine.high %v2011_v13, %v2043_v3  ;;  %v2066_v30 = vcombine.low %v2027_v12, %v2059_v11 }
 0x8c0   :  { %v1892_v40 = vcombine.low %v4082_v0, %v1852_v57  ;;  %v1893_v41 = vcombine.high %v4082_v0, %v1852_v57  ;;  %v1908_v42 = vcombine.low %v4085_v4, %v1859_v36  ;;  %v1909_v45 = vcombine.high %v4085_v4, %v1859_v36 }
 0x8c1   :  { %v2067_v0 = vcombine.high %v2027_v12, %v2059_v11 }
 0x8c2   :  { %v1900_v19 = vrot.slane %v1892_v40, %v3801_v17  ;;  %v1907_v27 = vrot.slane %v1893_v41, %v3801_v17  ;;  %v1916_v43 = vrot.slane %v1908_v42, %v3801_v17  ;;  %v1923_v15 = vrot.slane %v1909_v45, %v3801_v17 }
 0x8c4   :  { %v1924_v56 = vcombine.low %v3832_v34, %v1900_v19  ;;  %v1925_v4 = vcombine.high %v3832_v34, %v1900_v19  ;;  %v1926_v1 = vcombine.low %v3835_v35, %v1907_v27  ;;  %v1927_v33 = vcombine.high %v3835_v35, %v1907_v27 }
 0x8c5   :  { %v1928_v49 = vcombine.low %v3838_v37, %v1916_v43  ;;  %v1929_v10 = vcombine.high %v3838_v37, %v1916_v43  ;;  %v1930_v20 = vcombine.low %v3853_v39, %v1923_v15  ;;  %v1931_v17 = vcombine.high %v3853_v39, %v1923_v15 }
 0x8c6   :  { %v2515_v24 = vpack.c.bf16 %v2060_v46, %v1924_v56  ;;  %v2520_v48 = vpack.c.bf16 %v2061_v7, %v1925_v4  ;;  %v2525_v52 = vpack.c.bf16 %v2062_v21, %v1926_v1  ;;  %v2530_v63 = vpack.c.bf16 %v2063_v58, %v1927_v33 }
 0x8c7   :  { %v2535_v31 = vpack.c.bf16 %v2064_v47, %v1928_v49  ;;  %v2540_v53 = vpack.c.bf16 %v2065_v8, %v1929_v10  ;;  %v2545_v54 = vpack.c.bf16 %v2066_v30, %v1930_v20  ;;  %v2550_v34 = vpack.c.bf16 %v2067_v0, %v1931_v17 }
 0x8c8   :  { %2516 = vst [vmem:[#allocation2] sm:$0xff] %v2515_v24   ;;  %2572 = vst [vmem:[#allocation2 + $0x8] sm:$0xff] %v2520_v48  }
 0x8c9   :  { %2573 = vst [vmem:[#allocation2 + $0x10] sm:$0xff] %v2525_v52   ;;  %2574 = vst [vmem:[#allocation2 + $0x18] sm:$0xff] %v2530_v63  }
 0x8ca   :  { %2575 = vst [vmem:[#allocation2 + $0x20] sm:$0xff] %v2535_v31   ;;  %2576 = vst [vmem:[#allocation2 + $0x28] sm:$0xff] %v2540_v53  }
 0x8cb   :  { %2577 = vst [vmem:[#allocation2 + $0x30] sm:$0xff] %v2545_v54   ;;  %2578 = vst [vmem:[#allocation2 + $0x38] sm:$0xff] %v2550_v34  }
 0x8cf   :  { %v2988_v35 = vld [vmem:[#allocation2] sm:$0xff]   ;;  %v2989_v37 = vld [vmem:[#allocation2 + $0x8] sm:$0xff]  }
 0x8d0   :  { %2905 = vmatprep.mubr.bf16.mxu0 %v2988_v35  ;;  %v2990_v39 = vld [vmem:[#allocation2 + $0x10] sm:$0xff]   ;;  %v2991_v6 = vld [vmem:[#allocation2 + $0x18] sm:$0xff]  }
 0x8d1   :  { %2906 = vmatmul.mubr.bf16.vlgmr.msra.gmra.mxu0 %v2989_v37  ;;  %v2996_v44 = vld [vmem:[#allocation2 + $0x20] sm:$0xff]   ;;  %v2997_v61 = vld [vmem:[#allocation2 + $0x28] sm:$0xff]  }
 0x8d2   :  { %2909 = vmatprep.mubr.bf16.mxu0 %v2990_v39  ;;  %v2998_v16 = vld [vmem:[#allocation2 + $0x30] sm:$0xff]   ;;  %v2999_v5 = vld [vmem:[#allocation2 + $0x38] sm:$0xff]  }
 0x8d9   :  { %2910 = vmatmul.mubr.bf16.gmra.mxu0 %v2991_v6 }
 0x8da   :  { %2913 = vmatprep.mubr.bf16.mxu0 %v2996_v44 }
 0x8e1   :  { %2914 = vmatmul.mubr.bf16.gmra.mxu0 %v2997_v61 }
 0x8e2   :  { %2917 = vmatprep.mubr.bf16.mxu0 %v2998_v16 }
 0x8e9   :  { %2918 = vmatmul.mubr.bf16.gmra.mxu0 %v2999_v5 }
 0x991   :  { %v2907_v62 = vpop.f32.mrf.mxu0 }
 0x992   :  { %v2325_v29 = vadd.f32 %v2907_v62, %v2479_v55 }
 0x993   :  { %v2317_v14 = vpop.f32.mrf.mxu0 }
 0x994   :  { %v2318_v28 = vadd.f32 %v2479_v55, %v2317_v14 }
 0x995   :  { %v2908_v25 = vpop.f32.mrf.mxu0 }
 0x996   :  { %v2555_v26 = vpack.c.bf16 %v2325_v29, %v2318_v28 }
 0x997   :  { %v2320_v9 = vpop.f32.mrf.mxu0 }
 0x998   :  { %2556 = vst [vmem:[%s4181_s12] sm:$0xff] %v2555_v26  }
 0x999   :  { %v2911_v60 = vpop.f32.mrf.mxu0 }
 0x99a   :  { %v2339_v32 = vadd.f32 %v2911_v60, %v2479_v55 }
 0x99b   :  { %v2331_v23 = vpop.f32.mrf.mxu0 }
 0x99c   :  { %v2332_v18 = vadd.f32 %v2479_v55, %v2331_v23 }
 0x99d   :  { %v2912_v50 = vpop.f32.mrf.mxu0 }
 0x99e   :  { %v2560_v51 = vpack.c.bf16 %v2339_v32, %v2332_v18 }
 0x99f   :  { %v2334_v22 = vpop.f32.mrf.mxu0 }
 0x9a0   :  { %2579 = vst [vmem:[%s4181_s12 + $0x8] sm:$0xff] %v2560_v51  }
 0x9a1   :  { %v2915_v38 = vpop.f32.mrf.mxu0 }
 0x9a2   :  { %v2353_v3 = vadd.f32 %v2915_v38, %v2479_v55 }
 0x9a3   :  { %v2345_v13 = vpop.f32.mrf.mxu0 }
 0x9a4   :  { %v2346_v57 = vadd.f32 %v2479_v55, %v2345_v13 }
 0x9a5   :  { %v2916_v36 = vpop.f32.mrf.mxu0 }
 0x9a6   :  { %v2565_v2 = vpack.c.bf16 %v2353_v3, %v2346_v57 }
 0x9a7   :  { %v2348_v59 = vpop.f32.mrf.mxu0 }
 0x9a8   :  { %2580 = vst [vmem:[%s4181_s12 + $0x10] sm:$0xff] %v2565_v2  }
 0x9a9   :  { %v2919_v12 = vpop.f32.mrf.mxu0 }
 0x9aa   :  { %v2367_v40 = vadd.f32 %v2919_v12, %v2479_v55 }
 0x9ab   :  { %v2359_v11 = vpop.f32.mrf.mxu0 }
 0x9ac   :  { %v2360_v41 = vadd.f32 %v2479_v55, %v2359_v11 }
 0x9ad   :  { %v2920_v42 = vpop.f32.mrf.mxu0 }
 0x9ae   :  { %v2570_v45 = vpack.c.bf16 %v2367_v40, %v2360_v41 }
 0x9af   :  { %v2362_v46 = vpop.f32.mrf.mxu0 }
 0x9b0   :  { %2581 = vst [vmem:[%s4181_s12 + $0x18] sm:$0xff] %v2570_v45  }

</bundles_post_ra>
